<compile_context>
chip_gen: v5e
topology: v5e:2x2
jax: 0.10.0
libtpu: 0.0.40
codegen_flags: <defaults>
</compile_context>

<pallas_src>
import math

import jax
import jax.numpy as jnp
from jax import lax
from jax.experimental import pallas as pl
from jax.experimental.pallas import tpu as pltpu

LANE = 128        # padded per-block (q/k/v) width -> lane-tile aligned slices / stores
MXU_M = 256       # target rows per grid step (fills the MXU M dimension on v6e/v7x)
NEG_MASK = -1e30  # finite additive mask value; exp underflows to exactly 0.0 in f32


def _mha_kernel(x_ref, w_ref, b_ref, mask_ref, o_ref):
    """One grid step: TN independent instances stacked row-wise (TM = TN*B rows).

    x:    (TM, D)       stacked instance rows for this step
    w:    (D, 3*LANE)   [Wq^T*scale | Wk^T | Wv^T]   (resident across the grid)
    b:    (1, 3*LANE)   fused bias                    (resident across the grid)
    mask: (TM, TM)      0 where row/col belong to the same instance, NEG_MASK else
    o:    (TM, LANE)    lane-dense attention output (columns >= D are exactly 0)
    """
    x = x_ref[...]
    # Fused QKV projection: single lane-dense MXU matmul with M = TM (>= 256 when possible).
    qkv = jnp.dot(x, w_ref[...], preferred_element_type=jnp.float32) + b_ref[...]
    q = qkv[:, 0 * LANE:1 * LANE]      # 1/sqrt(head_dim) already folded into Wq / bq
    k = qkv[:, 1 * LANE:2 * LANE]
    v = qkv[:, 2 * LANE:3 * LANE]

    # energy = q @ k^T, contracting dim 1 of both operands (no materialized transpose
    # of k in the jaxpr; any vxpose Mosaic inserts is single-vreg XLU work hidden under
    # MXU slack).  The block-diagonal additive mask keeps the TN instances independent.
    energy = lax.dot_general(
        q, k, dimension_numbers=(((1,), (1,)), ((), ())),
        preferred_element_type=jnp.float32) + mask_ref[...]          # (TM, TM)

    m = jnp.max(energy, axis=-1, keepdims=True)
    e = jnp.exp(energy - m)                                          # masked entries -> 0
    s = jnp.sum(e, axis=-1, keepdims=True)
    r = pl.reciprocal(s, approx=True)                                # EUP vrcp
    r = r * (2.0 - s * r)                                            # Newton step -> f32 accuracy
    attn = e * r

    # attn is exactly zero off the instance diagonal, so this flat matmul equals the
    # per-instance attention @ V, again with M = TM and a lane-dense 128-wide store.
    o_ref[...] = jnp.dot(attn, v, preferred_element_type=jnp.float32)


def prepare_mha_params(wq, bq, wk, bk, wv, bv, num_heads):
    """One-time weight prep (call OUTSIDE the per-step path).

    Takes PyTorch-layout params ((out, in) weights, (out,) biases) and returns fused,
    pre-transposed, lane-padded, scale-folded operands:
      w_qkv: (D, 3*LANE) float32, b_qkv: (1, 3*LANE) float32.
    """
    D = wq.shape[0]
    assert D <= LANE, f"input_size={D} must be <= {LANE} for the lane-padded layout"
    assert D % num_heads == 0, "input_size must be divisible by num_heads"
    head_dim = D // num_heads
    scale = 1.0 / math.sqrt(float(head_dim))

    w_qkv = jnp.zeros((D, 3 * LANE), jnp.float32)
    w_qkv = w_qkv.at[:, 0 * LANE:0 * LANE + D].set(wq.T * scale)
    w_qkv = w_qkv.at[:, 1 * LANE:1 * LANE + D].set(wk.T)
    w_qkv = w_qkv.at[:, 2 * LANE:2 * LANE + D].set(wv.T)

    b_qkv = jnp.zeros((1, 3 * LANE), jnp.float32)
    b_qkv = b_qkv.at[0, 0 * LANE:0 * LANE + D].set(bq * scale)
    b_qkv = b_qkv.at[0, 1 * LANE:1 * LANE + D].set(bk)
    b_qkv = b_qkv.at[0, 2 * LANE:2 * LANE + D].set(bv)
    return w_qkv, b_qkv


@jax.jit
def mha_forward_batched(xs, w_qkv, b_qkv):
    """Batched forward for N independent module invocations.

    xs: (N, B, D) float32.  Returns a lane-dense (N, B, LANE) slab; columns >= D are
    exactly zero (slice [..., :D] for the logical result).
    """
    N, B, D = xs.shape

    # Instances per grid step: fill the MXU M dimension while keeping the row block
    # sublane-aligned (TM % 8 == 0) and not (much) larger than the actual workload.
    step = 8 // math.gcd(B, 8)                               # TN granularity for TM % 8 == 0
    tn = max(step, (max(1, MXU_M // B) // step) * step)      # target ~256 rows per step
    tn = min(tn, max(step, -(-N // step) * step))            # don't exceed the workload
    n_pad = -(-N // tn) * tn
    if n_pad != N:
        xs = jnp.pad(xs, ((0, n_pad - N), (0, 0), (0, 0)))   # zero instances; discarded below
    tm = tn * B
    grid = n_pad // tn

    x_flat = xs.reshape(n_pad * B, D)

    # Block-diagonal additive mask: rows of different instances never attend.
    inst = jnp.repeat(jnp.arange(tn, dtype=jnp.int32), B)
    mask = jnp.where(inst[:, None] == inst[None, :], 0.0, NEG_MASK).astype(jnp.float32)

    out_flat = pl.pallas_call(
        _mha_kernel,
        out_shape=jax.ShapeDtypeStruct((n_pad * B, LANE), jnp.float32),
        grid=(grid,),
        in_specs=[
            pl.BlockSpec((tm, D), lambda i: (i, 0)),         # per-step stacked x rows
            pl.BlockSpec((D, 3 * LANE), lambda i: (0, 0)),   # fused weights (resident)
            pl.BlockSpec((1, 3 * LANE), lambda i: (0, 0)),   # fused bias   (resident)
            pl.BlockSpec((tm, tm), lambda i: (0, 0)),        # block-diag mask (resident)
        ],
        out_specs=pl.BlockSpec((tm, LANE), lambda i: (i, 0)),
        compiler_params=pltpu.CompilerParams(
            dimension_semantics=("parallel",)),              # v7x: shard across both TCs
    )(x_flat, w_qkv, b_qkv, mask)

    return out_flat.reshape(n_pad, B, LANE)[:N]


def mha_forward(x, w_qkv, b_qkv, input_size):
    """PyTorch-parity path for a single (B, D) input: returns (B, seq_len, 1).

    The slice/reshape to the lane-sparse (B, D, 1) parity shape is done only at this
    boundary; fused consumers should prefer the lane-dense slab from
    mha_forward_batched directly (padded columns are exactly zero).
    """
    B, _ = x.shape
    slab = mha_forward_batched(x[None], w_qkv, b_qkv)[0]     # (B, LANE)
    return slab[:, :input_size].reshape(B, input_size, 1)


def _reference_single(x, wq, bq, wk, bk, wv, bv, num_heads):
    B, D = x.shape
    head_dim = D // num_heads
    q = x @ wq.T + bq
    k = x @ wk.T + bk
    v = x @ wv.T + bv
    energy = (q @ k.T) / jnp.sqrt(jnp.float32(head_dim))
    attn = jax.nn.softmax(energy, axis=-1)
    return attn @ v                                           # (B, D)


if __name__ == "__main__":
    batch_size = 8        # B (rows of the 2-D input == "batch_size" in the module)
    input_size = 32       # D == seq_len
    num_heads = 4
    n_instances = 64      # number of independent module invocations batched together

    key = jax.random.PRNGKey(0)
    kx, kwq, kbq, kwk, kbk, kwv, kbv = jax.random.split(key, 7)

    # Deterministic synthetic parameters (PyTorch Linear layout: (out, in) / (out,)).
    bound = 1.0 / math.sqrt(input_size)
    xs = jax.random.normal(kx, (n_instances, batch_size, input_size), jnp.float32)
    wq = jax.random.uniform(kwq, (input_size, input_size), jnp.float32, -bound, bound)
    bq = jax.random.uniform(kbq, (input_size,), jnp.float32, -bound, bound)
    wk = jax.random.uniform(kwk, (input_size, input_size), jnp.float32, -bound, bound)
    bk = jax.random.uniform(kbk, (input_size,), jnp.float32, -bound, bound)
    wv = jax.random.uniform(kwv, (input_size, input_size), jnp.float32, -bound, bound)
    bv = jax.random.uniform(kbv, (input_size,), jnp.float32, -bound, bound)

    # One-time weight prep (fuse / transpose / pad / fold scale) outside the call path.
    w_qkv, b_qkv = prepare_mha_params(wq, bq, wk, bk, wv, bv, num_heads)
    w_qkv, b_qkv = jax.block_until_ready((w_qkv, b_qkv))

    # Batched path: N module invocations in a single pallas_call (resident weights,
    # parallel grid axis, MXU-M-filled matmuls), lane-dense (N, B, 128) output.
    slab = jax.block_until_ready(mha_forward_batched(xs, w_qkv, b_qkv))
    assert slab.shape == (n_instances, batch_size, LANE), slab.shape

    ref = jax.vmap(
        lambda x: _reference_single(x, wq, bq, wk, bk, wv, bv, num_heads))(xs)
    assert jnp.allclose(slab[:, :, :input_size], ref, atol=1e-5, rtol=1e-5), \
        "batched mismatch vs reference"
    assert jnp.all(slab[:, :, input_size:] == 0.0), "padded lanes must be exactly zero"

    # PyTorch-parity single-call path: (B, seq_len, 1) exactly like the nn.Module forward.
    out1 = jax.block_until_ready(mha_forward(xs[0], w_qkv, b_qkv, input_size))
    assert out1.shape == (batch_size, input_size, 1), out1.shape
    assert jnp.allclose(out1[..., 0], ref[0], atol=1e-5, rtol=1e-5), \
        "single-instance mismatch vs reference"

    print("KERNEL_OK")
</pallas_src>

<mosaic_0001>
module attributes {stable_mosaic.version = 11 : i64} {
  func.func @_mha_kernel(%arg0: i32, %arg1: memref<256x32xf32, #tpu.memory_space<vmem>>, %arg2: memref<32x384xf32, #tpu.memory_space<vmem>>, %arg3: memref<1x384xf32, #tpu.memory_space<vmem>>, %arg4: memref<256x256xf32, #tpu.memory_space<vmem>>, %arg5: memref<256x128xf32, #tpu.memory_space<vmem>>) attributes {dimension_semantics = [#tpu.dimension_semantics<parallel>], iteration_bounds = array<i64: 2>, scalar_prefetch = 0 : i64, scratch_operands = 0 : i64, tpu.core_type = #tpu.core_type<tc>, window_params = [{transform_indices = @transform_0, window_bounds = array<i64: 256, 32>}, {pipeline_mode = #tpu.pipeline_mode<synchronous>, transform_indices = @transform_1, window_bounds = array<i64: 32, 384>}, {pipeline_mode = #tpu.pipeline_mode<synchronous>, transform_indices = @transform_2, window_bounds = array<i64: 1, 384>}, {pipeline_mode = #tpu.pipeline_mode<synchronous>, transform_indices = @transform_3, window_bounds = array<i64: 256, 256>}, {transform_indices = @transform_4, window_bounds = array<i64: 256, 128>}]} {
    %c0 = arith.constant 0 : index
    %c0_0 = arith.constant 0 : index
    %0 = vector.load %arg1[%c0, %c0_0] : memref<256x32xf32, #tpu.memory_space<vmem>>, vector<256x32xf32>
    %c0_1 = arith.constant 0 : index
    %c0_2 = arith.constant 0 : index
    %1 = vector.load %arg2[%c0_1, %c0_2] : memref<32x384xf32, #tpu.memory_space<vmem>>, vector<32x384xf32>
    %cst = arith.constant dense<0.000000e+00> : vector<256x384xf32>
    %2 = tpu.matmul %0, %1, %cst {dimension_numbers = #tpu.dot_dimension_numbers<[1], [0], [0], [1], [0, 0, 1, 1], [], []>} : vector<256x32xf32>, vector<32x384xf32>, vector<256x384xf32> -> vector<256x384xf32>
    %c0_3 = arith.constant 0 : index
    %c0_4 = arith.constant 0 : index
    %3 = vector.load %arg3[%c0_3, %c0_4] : memref<1x384xf32, #tpu.memory_space<vmem>>, vector<1x384xf32>
    %4 = vector.broadcast %3 : vector<1x384xf32> to vector<256x384xf32>
    %5 = arith.addf %2, %4 : vector<256x384xf32>
    %6 = vector.extract_strided_slice %5 {offsets = [0, 0], sizes = [256, 128], strides = [1, 1]} : vector<256x384xf32> to vector<256x128xf32>
    %7 = vector.extract_strided_slice %5 {offsets = [0, 128], sizes = [256, 128], strides = [1, 1]} : vector<256x384xf32> to vector<256x128xf32>
    %8 = vector.extract_strided_slice %5 {offsets = [0, 256], sizes = [256, 128], strides = [1, 1]} : vector<256x384xf32> to vector<256x128xf32>
    %cst_5 = arith.constant dense<0.000000e+00> : vector<256x256xf32>
    %9 = tpu.matmul %6, %7, %cst_5 {dimension_numbers = #tpu.dot_dimension_numbers<[1], [1], [0], [0], [0, 0, 1, 0], [], []>} : vector<256x128xf32>, vector<256x128xf32>, vector<256x256xf32> -> vector<256x256xf32>
    %c0_6 = arith.constant 0 : index
    %c0_7 = arith.constant 0 : index
    %10 = vector.load %arg4[%c0_6, %c0_7] : memref<256x256xf32, #tpu.memory_space<vmem>>, vector<256x256xf32>
    %11 = arith.addf %9, %10 : vector<256x256xf32>
    %cst_8 = arith.constant dense<0xFF800000> : vector<256xf32>
    %12 = vector.multi_reduction <maximumf>, %11, %cst_8 [1] : vector<256x256xf32> to vector<256xf32>
    %13 = vector.shape_cast %12 : vector<256xf32> to vector<256x1xf32>
    %14 = vector.broadcast %13 : vector<256x1xf32> to vector<256x256xf32>
    %15 = arith.subf %11, %14 : vector<256x256xf32>
    %16 = math.exp %15 : vector<256x256xf32>
    %cst_9 = arith.constant dense<0.000000e+00> : vector<256xf32>
    %17 = vector.multi_reduction <add>, %16, %cst_9 [1] : vector<256x256xf32> to vector<256xf32>
    %18 = vector.shape_cast %17 : vector<256xf32> to vector<256x1xf32>
    %19 = tpu.reciprocal %18 {approx = true} : vector<256x1xf32> -> vector<256x1xf32>
    %20 = arith.mulf %18, %19 : vector<256x1xf32>
    %cst_10 = arith.constant 2.000000e+00 : f32
    %21 = vector.broadcast %cst_10 : f32 to vector<256x1xf32>
    %22 = arith.subf %21, %20 : vector<256x1xf32>
    %23 = arith.mulf %19, %22 : vector<256x1xf32>
    %24 = vector.broadcast %23 : vector<256x1xf32> to vector<256x256xf32>
    %25 = arith.mulf %16, %24 : vector<256x256xf32>
    %cst_11 = arith.constant dense<0.000000e+00> : vector<256x128xf32>
    %26 = tpu.matmul %25, %8, %cst_11 {dimension_numbers = #tpu.dot_dimension_numbers<[1], [0], [0], [1], [0, 0, 1, 1], [], []>} : vector<256x256xf32>, vector<256x128xf32>, vector<256x128xf32> -> vector<256x128xf32>
    %c0_12 = arith.constant 0 : index
    %c0_13 = arith.constant 0 : index
    %27 = vector.load %arg5[%c0_12, %c0_13] : memref<256x128xf32, #tpu.memory_space<vmem>>, vector<256x128xf32>
    tpu.vector_store %arg5[%c0_12, %c0_13], %26 {strides = array<i32>} : memref<256x128xf32, #tpu.memory_space<vmem>>, vector<256x128xf32>,
    return
  }
  func.func @transform_0(%arg0: i32) -> (i32, i32) {
    %c0_i32 = arith.constant 0 : i32
    %c0_i32_0 = arith.constant 0 : i32
    return %arg0, %c0_i32 : i32, i32
  }
  func.func @transform_1(%arg0: i32) -> (i32, i32) {
    %c0_i32 = arith.constant 0 : i32
    %c0_i32_0 = arith.constant 0 : i32
    %c0_i32_1 = arith.constant 0 : i32
    return %c0_i32, %c0_i32_0 : i32, i32
  }
  func.func @transform_2(%arg0: i32) -> (i32, i32) {
    %c0_i32 = arith.constant 0 : i32
    %c0_i32_0 = arith.constant 0 : i32
    %c0_i32_1 = arith.constant 0 : i32
    return %c0_i32, %c0_i32_0 : i32, i32
  }
  func.func @transform_3(%arg0: i32) -> (i32, i32) {
    %c0_i32 = arith.constant 0 : i32
    %c0_i32_0 = arith.constant 0 : i32
    %c0_i32_1 = arith.constant 0 : i32
    return %c0_i32, %c0_i32_0 : i32, i32
  }
  func.func @transform_4(%arg0: i32) -> (i32, i32) {
    %c0_i32 = arith.constant 0 : i32
    %c0_i32_0 = arith.constant 0 : i32
    return %arg0, %c0_i32 : i32, i32
  }
}

</mosaic_0001>

<bundles_post_ra>
// kernel: eq.8
= control target key start
LH: loop header
LB: loop body
LE: loop exit
PB: predicated region body
PF: predicated region fallthrough
CT: control target
= control target key end

     0   :  { %s7_s6 = smov 3  ;;  %s21_s9 = smov 3  ;;  %vm4_vm0 = vcmask 64512   ;;  %vm11_vm1 = vcmask 1048512   ;;  %vm18_vm2 = vcmask 982912   ;;  %vm25_vm3 = vcmask 917312   ;;  %s223_s0 = inlined_call_operand.vmem [shape: s32[32,8], index: 0, kind: input, shape index: {}]   ;;  %s224_s1 = inlined_call_operand.vmem [shape: s32[256], index: 1, kind: output, shape index: {}]  }
   0x1   :  { %v117_v0 = vld [vmem:[%s223_s0 + $0xf] ss:$16 sm:%s7_s6]   ;;  %s147_s10 = smov 120   ;;  %v119_v1 = vld [vmem:[%s223_s0 + $0xd] ss:$16 sm:%s21_s9]   ;;  %s148_s13 = smov 104  }
   0x2   :  { %9 = vrot.lane.b32.xlu0 %v117_v0, %s147_s10  ;;  %23 = vrot.lane.b32.xlu1 %v119_v1, %s148_s13  ;;  %s14_s14 = smov 3  ;;  %s28_s15 = smov 3  ;;  %vm32_vm4 = vcmask 851712   ;;  %vm39_vm5 = vcmask 786112   ;;  %vm46_vm6 = vcmask 720512   ;;  %vm53_vm7 = vcmask 654912  }
   0x3   :  { %v118_v2 = vld [vmem:[%s223_s0 + $0xe] ss:$16 sm:%s14_s14]   ;;  %v120_v3 = vld [vmem:[%s223_s0 + $0xc] ss:$16 sm:%s28_s15]   ;;  %s35_s20 = smov 3  ;;  %s149_s23 = smov 112  }
   0x4   :  { %v121_v4 = vld [vmem:[%s223_s0 + $0xb] ss:$16 sm:%s35_s20]   ;;  %s150_s24 = smov 88   ;;  %s151_s25 = smov 96   ;;  %vm60_vm8 = vcmask 589312   ;;  %vm67_vm9 = vcmask 523712  }
   0x5   :  { %37 = vrot.lane.b32.xlu2 %v121_v4, %s150_s24  ;;  %s49_s26 = smov 3  ;;  %s42_s27 = smov 3  ;;  %vm74_vm10 = vcmask 458112   ;;  %vm81_vm11 = vcmask 392512   ;;  %vm88_vm12 = vcmask 326912   ;;  %vm95_vm13 = vcmask 261312  }
   0x6   :  { %s56_s28 = smov 3  ;;  %v123_v5 = vld [vmem:[%s223_s0 + $0x9] ss:$16 sm:%s49_s26]   ;;  %v122_v6 = vld [vmem:[%s223_s0 + $0xa] ss:$16 sm:%s42_s27]   ;;  %s152_s6 = smov 72  }
   0x7   :  { %v124_v7 = vld [vmem:[%s223_s0 + $0x8] ss:$16 sm:%s56_s28]   ;;  %s153_s7 = smov 80   ;;  %s154_s8 = smov 64   ;;  %vm102_vm14 = vcmask 195712   ;;  %vm109_vm15 = vcmask 130112  }
   0x8   :  { %s70_s9 = smov 3  ;;  %s63_s10 = smov 3 }
   0x9   :  { %s77_s11 = smov 3  ;;  %v126_v8 = vld [vmem:[%s223_s0 + $0x6] ss:$16 sm:%s70_s9]   ;;  %v125_v9 = vld [vmem:[%s223_s0 + $0x7] ss:$16 sm:%s63_s10]   ;;  %s155_s18 = smov 48  }
   0xa   :  { %16 = vrot.lane.b32.xlu0 %v118_v2, %s149_s23  ;;  %30 = vrot.lane.b32.xlu1 %v120_v3, %s151_s25  ;;  %v127_v10 = vld [vmem:[%s223_s0 + $0x5] ss:$16 sm:%s77_s11]   ;;  %s156_s19 = smov 56   ;;  %s157_s20 = smov 40  }
   0xb   :  { %s91_s21 = smov 3  ;;  %s84_s22 = smov 3 }
   0xc   :  { %s98_s23 = smov 3  ;;  %v129_v11 = vld [vmem:[%s223_s0 + $0x3] ss:$16 sm:%s91_s21]   ;;  %v128_v12 = vld [vmem:[%s223_s0 + $0x4] ss:$16 sm:%s84_s22]   ;;  %s158_s30 = smov 24  }
   0xd   :  { %44 = vrot.lane.b32.xlu2 %v122_v6, %s153_s7  ;;  %v130_v13 = vld [vmem:[%s223_s0 + $0x2] ss:$16 sm:%s98_s23]   ;;  %s159_s2 = smov 32   ;;  %s160_s3 = smov 16  }
   0xe   :  { %s105_s4 = smov 3  ;;  %s161_s7 = smov 8  }
   0xf   :  { %v131_v14 = vld [vmem:[%s223_s0 + $0x1] ss:$16 sm:%s105_s4]  }
  0x12   :  { %51 = vrot.lane.b32.xlu0 %v123_v5, %s152_s6  ;;  %58 = vrot.lane.b32.xlu1 %v124_v7, %s154_s8  ;;  %s2_s8 = smov 3 }
  0x13   :  { %v3_v15 = vld [vmem:[%s223_s0] ss:$16 sm:%s2_s8]  }
  0x14   :  { %5 = vst.msk [vmem:[#allocation0] sm:$0x3] %vm4_vm0, %v3_v15  }
  0x15   :  { %65 = vrot.lane.b32.xlu2 %v125_v9, %s156_s19 }
  0x1a   :  { %72 = vrot.lane.b32.xlu0 %v126_v8, %s155_s18  ;;  %79 = vrot.lane.b32.xlu1 %v127_v10, %s157_s20 }
  0x1d   :  { %86 = vrot.lane.b32.xlu2 %v128_v12, %s159_s2 }
  0x22   :  { %93 = vrot.lane.b32.xlu0 %v129_v11, %s158_s30  ;;  %100 = vrot.lane.b32.xlu1 %v130_v13, %s160_s3 }
  0x25   :  { %107 = vrot.lane.b32.xlu2 %v131_v14, %s161_s7 }
  0x5f   :  { %v38_v16 = vpop.permute.xlu2 %37  }
  0x67   :  { %v45_v17 = vpop.permute.xlu2 %44  }
  0x6f   :  { %v66_v19 = vpop.permute.xlu2 %65  }
  0x74   :  { %v10_v18 = vpop.permute.xlu0 %9   ;;  %v24_v20 = vpop.permute.xlu1 %23  }
  0x75   :  { %12 = vst.msk [vmem:[#allocation0] sm:$0x3] %vm11_vm1, %v10_v18  }
  0x77   :  { %v87_v22 = vpop.permute.xlu2 %86  }
  0x7c   :  { %v17_v21 = vpop.permute.xlu0 %16   ;;  %v31_v23 = vpop.permute.xlu1 %30  }
  0x7d   :  { %19 = vst.msk [vmem:[#allocation0] sm:$0x3] %vm18_vm2, %v17_v21  }
  0x7e   :  { %26 = vst.msk [vmem:[#allocation0] sm:$0x3] %vm25_vm3, %v24_v20  }
  0x7f   :  { %33 = vst.msk [vmem:[#allocation0] sm:$0x3] %vm32_vm4, %v31_v23   ;;  %v108_v25 = vpop.permute.xlu2 %107  }
  0x80   :  { %40 = vst.msk [vmem:[#allocation0] sm:$0x3] %vm39_vm5, %v38_v16  }
  0x81   :  { %47 = vst.msk [vmem:[#allocation0] sm:$0x3] %vm46_vm6, %v45_v17  }
  0x84   :  { %v52_v24 = vpop.permute.xlu0 %51   ;;  %v59_v26 = vpop.permute.xlu1 %58  }
  0x85   :  { %54 = vst.msk [vmem:[#allocation0] sm:$0x3] %vm53_vm7, %v52_v24  }
  0x86   :  { %61 = vst.msk [vmem:[#allocation0] sm:$0x3] %vm60_vm8, %v59_v26  }
  0x87   :  { %68 = vst.msk [vmem:[#allocation0] sm:$0x3] %vm67_vm9, %v66_v19  }
  0x8c   :  { %v73_v27 = vpop.permute.xlu0 %72   ;;  %v80_v28 = vpop.permute.xlu1 %79  }
  0x8d   :  { %75 = vst.msk [vmem:[#allocation0] sm:$0x3] %vm74_vm10, %v73_v27  }
  0x8e   :  { %82 = vst.msk [vmem:[#allocation0] sm:$0x3] %vm81_vm11, %v80_v28  }
  0x8f   :  { %89 = vst.msk [vmem:[#allocation0] sm:$0x3] %vm88_vm12, %v87_v22  }
  0x94   :  { %v94_v29 = vpop.permute.xlu0 %93   ;;  %v101_v30 = vpop.permute.xlu1 %100  }
  0x95   :  { %96 = vst.msk [vmem:[#allocation0] sm:$0x3] %vm95_vm13, %v94_v29  }
  0x96   :  { %103 = vst.msk [vmem:[#allocation0] sm:$0x3] %vm102_vm14, %v101_v30  }
  0x97   :  { %110 = vst.msk [vmem:[#allocation0] sm:$0x3] %vm109_vm15, %v108_v25  }
  0x9e   :  { %v113_v31 = vld [vmem:[#allocation0] sm:$0x3] }
  0x9f   :  { %116 = vst [vmem:[%s224_s1] sm:$0x3] %v113_v31 }

// kernel: mha_forward_batched.1
= control target key start
LH: loop header
LB: loop body
LE: loop exit
PB: predicated region body
PF: predicated region fallthrough
CT: control target
= control target key end

     0   :  { %9 = vsyncpa [#allocation3], 0  ;;  %s3872_s0 = inlined_call_operand.vmem [shape: f32[512,32], index: 0, kind: input, shape index: {}]   ;;  %s3873_s1 = inlined_call_operand.vmem [shape: f32[32,384], index: 1, kind: input, shape index: {}]   ;;  %s3874_s2 = inlined_call_operand.vmem [shape: f32[1,384], index: 2, kind: input, shape index: {}]   ;;  %s3875_s3 = inlined_call_operand.vmem [shape: f32[256,256], index: 3, kind: input, shape index: {}]   ;;  %s3876_s4 = inlined_call_operand.hbm [shape: f32[512,128], index: 4, kind: output, shape index: {}]  }
   0x1   :  { %11 = vsyncpa [#allocation3 + $0x1], 0  ;;  %s2334_s15 = smov 0   ;;  %s2336_s16 = smov 0  }
   0x2   :  { %s2338_s17 = smov 0   ;;  %s2340_s18 = smov 0  }
   0x3 LB: > { %s2355_s19 = sadd.s32 4294967295, %s2305_s18   ;;  %s1889_s20 = sadd.s32 4294967294, %s2305_s18   ;;  %s2305_s18 = sphi %s2340_s18, %s3882_s18   ;;  %s2301_s17 = sphi %s2338_s17, %s3881_s17   ;;  %s2297_s16 = sphi %s2336_s16, %s3880_s16   ;;  %s2293_s15 = sphi %s2334_s15, %s3879_s15  }
   0x4   : > { %s2359_s21 = sadd.s32 1, %s2305_s18   ;;  %s113_s22 = sadd.s32 1, %s2301_s17 }
   0x5   : > { %s110_s23 = ssub.s32 %s2305_s18, %s2359_s21  ;;  %p123_p0 = scmp.ne.s32.totalorder %s2301_s17, %s2297_s16 }
   0x6   : > { %p111_p1 = scmp.eq.s32.totalorder %s110_s23, 0  ;;  %p124_p2 = scmp.eq.s32.totalorder %s2355_s19, 1 }
   0x7   : > { %p129_p3 = scmp.ne.s32.totalorder %s2297_s16, %s2293_s15  ;;  %p130_p4 = scmp.eq.s32.totalorder %s1889_s20, 1 }
   0x8   : > { %s2370_s24 = scalar_select %p111_p1, %s2301_s17, %s113_s22  }
   0x9   : > { %p2372_p5 = por %p124_p2, %p123_p0  ;;  %p2376_p6 = por %p130_p4, %p129_p3 }
   0xa   : > { %p1892_p7 = scmp.ge.s32.totalorder %s2305_s18, 1  ;;  %p166_p8 = scmp.lt.s32.totalorder %s2305_s18, 3 }
   0xc   : > { %p167_p9 = pnand %p1892_p7, %p166_p8 }
   0xd   : > { %s1894_s7 = sshll.u32 (!%p167_p9), %s2355_s19, 5  ;;  %s189_s9 = sand.u32 (!%p167_p9), 1, %s2297_s16  }
   0xe   : > { %170 = sbr.rel (%p167_p9) target bundleno = 1401 (0x579), region = 36  ;;  %p193_p10 = scmp.lt.s32.totalorder (!%p167_p9), %s1894_s7, 63 }
   0xf   : > { %s1893_s10 = sshll.u32 (!%p167_p9), %s189_s9, 8  ;;  %s1997_s14 = sshll.u32 (!%p167_p9), %s2355_s19, 8 }
  0x10   : > { %s3534_s11 = scalar_lea.vmem (!%p167_p9), [#allocation2], %s1893_s10  ;;  %s1823_s23 = scalar_lea.hbm (!%p167_p9), %s3876_s4, %s1997_s14 }
  0x11   : > { %s1826_s28 = sshll.u32 (!%p167_p9), %s1823_s23, 4  ;;  %s1812_s29 = scalar_lea.sflag (!%p167_p9), [#allocation3], %s189_s9  ;;  %s1827_s28 = int_to_ptr.hbm [resolvable:$true] %s1826_s28 }
  0x13   : > { %v240_v0 = vld [vmem:[%s3873_s1 + $0x48] sm:$0xff]  ;;  %v241_v1 = vld [vmem:[%s3873_s1 + $0x50] sm:$0xff]  ;;  %v238_v3 = vld [vmem:[%s3873_s1 + $0x38] sm:$0xff]  ;;  %s3884_s7 = smov (!%p193_p10, %s1894_s7), 63  ;;  %vm251_vm0 = vcmask 261120  }
  0x14   : > { %v237_v2 = vld [vmem:[%s3873_s1 + $0x30] sm:$0xff]  ;;  %360 = vmatpush.msra.mxu0 %v240_v0  ;;  %2002 = vmatpush.msra.mxu1 %v241_v1  ;;  %v234_v4 = vld [vmem:[%s3873_s1 + $0x18] sm:$0xff]  ;;  %v235_v5 = vld [vmem:[%s3873_s1 + $0x20] sm:$0xff]  ;;  %s1895_s27 = sshll.u32 %s3884_s7, 3  ;;  %s2263_s7 = scalar_lea.hbm %s3876_s4, 512 }
  0x15   : > { %1998 = vmatpush.msra.mxu3 %v240_v0  ;;  %v231_v6 = vld [vmem:[%s3873_s1] sm:$0xff]  ;;  %v232_v7 = vld [vmem:[%s3873_s1 + $0x8] sm:$0xff]  ;;  %s2410_s30 = scalar_lea.vmem %s3872_s0, %s1895_s27  ;;  %v242_v54 = vld [vmem:[%s3873_s1 + $0x58] sm:$0xff]  ;;  %s1824_s27 = sshll.u32 %s3534_s11, 4  ;;  %s1825_s27 = int_to_ptr.vmem [resolvable:$true] %s1824_s27 }
  0x16   : > { %361 = vmatpush.msra.mxu0 %v237_v2  ;;  %2003 = vmatpush.msra.mxu1 %v238_v3  ;;  %v2413_v8 = vld [vmem:[%s2410_s30] sm:$0xff]  ;;  %v2425_v10 = vld [vmem:[%s2410_s30 + $0x8] sm:$0xff]  ;;  %v2437_v12 = vld [vmem:[%s2410_s30 + $0x10] sm:$0xff] }
  0x17   : > { %1999 = vmatpush.msra.mxu3 %v237_v2  ;;  %v2416_v9 = vld [vmem:[%s2410_s30 + $0x40] sm:$0xff]  ;;  %v2428_v11 = vld [vmem:[%s2410_s30 + $0x48] sm:$0xff]  ;;  %v2440_v13 = vld [vmem:[%s2410_s30 + $0x50] sm:$0xff]  ;;  %2006 = vmatpush.msra.mxu2 %v242_v54 }
  0x18   : > { %362 = vmatpush.msra.mxu0 %v234_v4  ;;  %2004 = vmatpush.msra.mxu1 %v235_v5  ;;  %v2449_v14 = vld [vmem:[%s2410_s30 + $0x18] sm:$0xff]  ;;  %v2461_v16 = vld [vmem:[%s2410_s30 + $0x20] sm:$0xff]  ;;  %v2473_v18 = vld [vmem:[%s2410_s30 + $0x28] sm:$0xff] }
  0x19   : > { %2000 = vmatpush.msra.mxu3 %v234_v4  ;;  %v2452_v15 = vld [vmem:[%s2410_s30 + $0x58] sm:$0xff]  ;;  %v2464_v17 = vld [vmem:[%s2410_s30 + $0x60] sm:$0xff]  ;;  %v2476_v19 = vld [vmem:[%s2410_s30 + $0x68] sm:$0xff] }
  0x1a   : > { %363 = vmatpush.msra.mxu0 %v231_v6  ;;  %2005 = vmatpush.msra.mxu1 %v232_v7  ;;  %v2485_v20 = vld [vmem:[%s2410_s30 + $0x30] sm:$0xff]  ;;  %v2497_v22 = vld [vmem:[%s2410_s30 + $0x38] sm:$0xff]  ;;  %v2509_v24 = vld [vmem:[%s2410_s30 + $0x80] sm:$0xff] }
  0x1b   : > { %1896 = vmatmul.msk.f32.vlgmr.msra.gmra.mxu0 %vm251_vm0, %v2413_v8  ;;  %1936 = vmatmul.msk.f32.vlgmr.msra.gmra.mxu1 %vm251_vm0, %v2416_v9  ;;  %v2488_v21 = vld [vmem:[%s2410_s30 + $0x70] sm:$0xff]  ;;  %v2500_v23 = vld [vmem:[%s2410_s30 + $0x78] sm:$0xff]  ;;  %v2518_v25 = vld [vmem:[%s2410_s30 + $0x88] sm:$0xff] }
  0x1c   : > { %473 = vmatpush.msrb.mxu0 %v241_v1  ;;  %2001 = vmatpush.msra.mxu3 %v231_v6  ;;  %v2527_v26 = vld [vmem:[%s2410_s30 + $0x90] sm:$0xff]  ;;  %v2536_v27 = vld [vmem:[%s2410_s30 + $0x98] sm:$0xff]  ;;  %v2545_v28 = vld [vmem:[%s2410_s30 + $0xa0] sm:$0xff] }
  0x1d   : > { %1904 = vmatmul.msk.f32.vlgmr.msra.gmra.mxu3 %vm251_vm0, %v2416_v9  ;;  %v2554_v29 = vld [vmem:[%s2410_s30 + $0xa8] sm:$0xff]  ;;  %v2563_v30 = vld [vmem:[%s2410_s30 + $0xb0] sm:$0xff]  ;;  %v2572_v31 = vld [vmem:[%s2410_s30 + $0xb8] sm:$0xff] }
  0x1e   : > { %474 = vmatpush.msrb.mxu0 %v238_v3  ;;  %v2585_v34 = vld [vmem:[%s2410_s30 + $0xc0] sm:$0xff]  ;;  %v2596_v37 = vld [vmem:[%s2410_s30 + $0xc8] sm:$0xff]  ;;  %v2605_v40 = vld [vmem:[%s2410_s30 + $0xd0] sm:$0xff] }
  0x1f   : > { %v2614_v43 = vld [vmem:[%s2410_s30 + $0xd8] sm:$0xff]  ;;  %v2623_v46 = vld [vmem:[%s2410_s30 + $0xe0] sm:$0xff]  ;;  %v2632_v49 = vld [vmem:[%s2410_s30 + $0xe8] sm:$0xff] }
  0x20   : > { %475 = vmatpush.msrb.mxu0 %v235_v5  ;;  %v2641_v52 = vld [vmem:[%s2410_s30 + $0xf0] sm:$0xff]  ;;  %v2648_v53 = vld [vmem:[%s3874_s2] sm:$0x7]  ;;  %v2661_v58 = vld [vmem:[%s2410_s30 + $0xf8] sm:$0xff]  ;;  %s2257_s30 = sshra.s32 %s1827_s28, 4  ;;  %s2258_s30 = int_to_ptr.hbm [resolvable:$true] %s2257_s30 }
  0x21   : > { %v2656_v55 = vperm.slane %v2648_v53, 1  ;;  %v239_v59 = vld [vmem:[%s3873_s1 + $0x40] sm:$0xff]  ;;  %v236_v61 = vld [vmem:[%s3873_s1 + $0x28] sm:$0xff]  ;;  %v233_v62 = vld [vmem:[%s3873_s1 + $0x10] sm:$0xff]  ;;  %s2259_s19 = scalar_lea.hbm %s2258_s30, 256  ;;  %p2264_p0 = scmp.lt.s32.totalorder %s2258_s30, %s3876_s4 }
  0x22   : > { %476 = vmatpush.msrb.mxu0 %v232_v7  ;;  %2007 = vmatpush.msra.mxu2 %v239_v59  ;;  %p2260_p11 = scmp.ne.s32.totalorder %s2258_s30, %s2259_s19  ;;  %p2265_p1 = scmp.lt.s32.totalorder %s2263_s7, %s2259_s19 }
  0x23   : > { %1897 = vmatmul.msk.f32.gmra.mxu0 %vm251_vm0, %v2425_v10  ;;  %1937 = vmatmul.msk.f32.gmra.mxu1 %vm251_vm0, %v2428_v11 }
  0x24   : > { %586 = vmatpush.msra.mxu0 %v242_v54  ;;  %2008 = vmatpush.msra.mxu2 %v236_v61  ;;  %p2261_p12 = pnand %p2260_p11, %p2372_p5  ;;  %p2266_p2 = por %p2265_p1, %p2264_p0 }
  0x25   : > { %1905 = vmatmul.msk.f32.gmra.mxu3 %vm251_vm0, %v2428_v11 }
  0x26   : > { %587 = vmatpush.msra.mxu0 %v239_v59  ;;  %2009 = vmatpush.msra.mxu2 %v233_v62  ;;  %p2262_p13 = pneg %p2261_p12 }
  0x27   : > { %1968 = vmatmul.msk.f32.vlgmr.msra.gmra.mxu2 %vm251_vm0, %v2416_v9 }
  0x28   : > { %588 = vmatpush.msra.mxu0 %v236_v61  ;;  %p2267_p3 = pnand %p2266_p2, %p2262_p13 }
  0x2a   : > { %589 = vmatpush.msra.mxu0 %v233_v62 }
  0x2b   : > { %1898 = vmatmul.msk.f32.gmra.mxu0 %vm251_vm0, %v2437_v12  ;;  %1938 = vmatmul.msk.f32.gmra.mxu1 %vm251_vm0, %v2440_v13 }
  0x2d   : > { %1906 = vmatmul.msk.f32.gmra.mxu3 %vm251_vm0, %v2440_v13 }
  0x2f   : > { %1969 = vmatmul.msk.f32.gmra.mxu2 %vm251_vm0, %v2428_v11 }
  0x33   : > { %1899 = vmatmul.msk.f32.gmra.mxu0 %vm251_vm0, %v2449_v14  ;;  %1939 = vmatmul.msk.f32.gmra.mxu1 %vm251_vm0, %v2452_v15 }
  0x35   : > { %1907 = vmatmul.msk.f32.gmra.mxu3 %vm251_vm0, %v2452_v15 }
  0x37   : > { %1970 = vmatmul.msk.f32.gmra.mxu2 %vm251_vm0, %v2440_v13 }
  0x3b   : > { %1900 = vmatmul.msk.f32.gmra.mxu0 %vm251_vm0, %v2461_v16  ;;  %1940 = vmatmul.msk.f32.gmra.mxu1 %vm251_vm0, %v2464_v17 }
  0x3d   : > { %1908 = vmatmul.msk.f32.gmra.mxu3 %vm251_vm0, %v2464_v17 }
  0x3f   : > { %1971 = vmatmul.msk.f32.gmra.mxu2 %vm251_vm0, %v2452_v15 }
  0x43   : > { %1901 = vmatmul.msk.f32.gmra.mxu0 %vm251_vm0, %v2473_v18  ;;  %1941 = vmatmul.msk.f32.gmra.mxu1 %vm251_vm0, %v2476_v19 }
  0x45   : > { %1909 = vmatmul.msk.f32.gmra.mxu3 %vm251_vm0, %v2476_v19 }
  0x47   : > { %1972 = vmatmul.msk.f32.gmra.mxu2 %vm251_vm0, %v2464_v17 }
  0x4b   : > { %1902 = vmatmul.msk.f32.gmra.mxu0 %vm251_vm0, %v2485_v20  ;;  %1942 = vmatmul.msk.f32.gmra.mxu1 %vm251_vm0, %v2488_v21 }
  0x4d   : > { %1910 = vmatmul.msk.f32.gmra.mxu3 %vm251_vm0, %v2488_v21 }
  0x4f   : > { %1973 = vmatmul.msk.f32.gmra.mxu2 %vm251_vm0, %v2476_v19 }
  0x53   : > { %1903 = vmatmul.msk.f32.gmra.mxu0 %vm251_vm0, %v2497_v22  ;;  %1943 = vmatmul.msk.f32.gmra.mxu1 %vm251_vm0, %v2500_v23 }
  0x55   : > { %1911 = vmatmul.msk.f32.gmra.mxu3 %vm251_vm0, %v2500_v23 }
  0x57   : > { %1974 = vmatmul.msk.f32.gmra.mxu2 %vm251_vm0, %v2488_v21 }
  0x5b   : > { %1928 = vmatmul.msk.f32.vlgmr.msrb.gmra.mxu0 %vm251_vm0, %v2413_v8  ;;  %1944 = vmatmul.msk.f32.gmra.mxu1 %vm251_vm0, %v2509_v24 }
  0x5d   : > { %1912 = vmatmul.msk.f32.gmra.mxu3 %vm251_vm0, %v2509_v24 }
  0x5f   : > { %1975 = vmatmul.msk.f32.gmra.mxu2 %vm251_vm0, %v2500_v23 }
  0x63   : > { %1929 = vmatmul.msk.f32.gmra.mxu0 %vm251_vm0, %v2425_v10  ;;  %1945 = vmatmul.msk.f32.gmra.mxu1 %vm251_vm0, %v2518_v25 }
  0x65   : > { %1913 = vmatmul.msk.f32.gmra.mxu3 %vm251_vm0, %v2518_v25 }
  0x67   : > { %1976 = vmatmul.msk.f32.gmra.mxu2 %vm251_vm0, %v2509_v24 }
  0x6b   : > { %1930 = vmatmul.msk.f32.gmra.mxu0 %vm251_vm0, %v2437_v12  ;;  %1946 = vmatmul.msk.f32.gmra.mxu1 %vm251_vm0, %v2527_v26 }
  0x6d   : > { %1914 = vmatmul.msk.f32.gmra.mxu3 %vm251_vm0, %v2527_v26 }
  0x6f   : > { %1977 = vmatmul.msk.f32.gmra.mxu2 %vm251_vm0, %v2518_v25 }
  0x73   : > { %1931 = vmatmul.msk.f32.gmra.mxu0 %vm251_vm0, %v2449_v14  ;;  %1947 = vmatmul.msk.f32.gmra.mxu1 %vm251_vm0, %v2536_v27 }
  0x75   : > { %1915 = vmatmul.msk.f32.gmra.mxu3 %vm251_vm0, %v2536_v27 }
  0x77   : > { %1978 = vmatmul.msk.f32.gmra.mxu2 %vm251_vm0, %v2527_v26 }
  0x7b   : > { %1932 = vmatmul.msk.f32.gmra.mxu0 %vm251_vm0, %v2461_v16  ;;  %1948 = vmatmul.msk.f32.gmra.mxu1 %vm251_vm0, %v2545_v28 }
  0x7d   : > { %1916 = vmatmul.msk.f32.gmra.mxu3 %vm251_vm0, %v2545_v28 }
  0x7f   : > { %1979 = vmatmul.msk.f32.gmra.mxu2 %vm251_vm0, %v2536_v27 }
  0x83   : > { %1933 = vmatmul.msk.f32.gmra.mxu0 %vm251_vm0, %v2473_v18  ;;  %1949 = vmatmul.msk.f32.gmra.mxu1 %vm251_vm0, %v2554_v29 }
  0x85   : > { %1917 = vmatmul.msk.f32.gmra.mxu3 %vm251_vm0, %v2554_v29 }
  0x87   : > { %1980 = vmatmul.msk.f32.gmra.mxu2 %vm251_vm0, %v2545_v28 }
  0x8b   : > { %1934 = vmatmul.msk.f32.gmra.mxu0 %vm251_vm0, %v2485_v20  ;;  %1950 = vmatmul.msk.f32.gmra.mxu1 %vm251_vm0, %v2563_v30 }
  0x8d   : > { %1918 = vmatmul.msk.f32.gmra.mxu3 %vm251_vm0, %v2563_v30 }
  0x8f   : > { %1981 = vmatmul.msk.f32.gmra.mxu2 %vm251_vm0, %v2554_v29 }
  0x93   : > { %1935 = vmatmul.msk.f32.gmra.mxu0 %vm251_vm0, %v2497_v22  ;;  %1951 = vmatmul.msk.f32.gmra.mxu1 %vm251_vm0, %v2572_v31 }
  0x95   : > { %1919 = vmatmul.msk.f32.gmra.mxu3 %vm251_vm0, %v2572_v31 }
  0x97   : > { %1982 = vmatmul.msk.f32.gmra.mxu2 %vm251_vm0, %v2563_v30 }
  0x98   : > { %v2580_v32 = vpop.f32.mrf.mxu0  ;;  %v2582_v33 = vpop.f32.mrf.mxu1 }
  0x9b   : > { %1952 = vmatmul.msk.f32.gmra.mxu1 %vm251_vm0, %v2585_v34  ;;  %1960 = vmatmul.msk.f32.vlgmr.msra.gmra.mxu0 %vm251_vm0, %v2413_v8 }
  0x9d   : > { %1920 = vmatmul.msk.f32.gmra.mxu3 %vm251_vm0, %v2585_v34 }
  0x9f   : > { %1983 = vmatmul.msk.f32.gmra.mxu2 %vm251_vm0, %v2572_v31 }
  0xa0   : > { %v2591_v35 = vpop.f32.mrf.mxu0  ;;  %v2593_v36 = vpop.f32.mrf.mxu1 }
  0xa1   : > { %v506_v11 = vadd.f32 %v2593_v36, %v2656_v55  ;;  %v2712_v13 = vpop.f32.mrf.mxu3 }
  0xa3   : > { %1953 = vmatmul.msk.f32.gmra.mxu1 %vm251_vm0, %v2596_v37  ;;  %1961 = vmatmul.msk.f32.gmra.mxu0 %vm251_vm0, %v2425_v10  ;;  %v503_v10 = vadd.f32 %v2582_v33, %v2656_v55 }
  0xa5   : > { %1921 = vmatmul.msk.f32.gmra.mxu3 %vm251_vm0, %v2596_v37 }
  0xa7   : > { %1984 = vmatmul.msk.f32.gmra.mxu2 %vm251_vm0, %v2585_v34 }
  0xa8   : > { %v2602_v38 = vpop.f32.mrf.mxu0  ;;  %v508_v39 = vpop.f32.mrf.mxu1 }
  0xa9   : > { %v509_v7 = vadd.f32 %v508_v39, %v2656_v55  ;;  %v2720_v33 = vpop.f32.mrf.mxu3 }
  0xab   : > { %1954 = vmatmul.msk.f32.gmra.mxu1 %vm251_vm0, %v2605_v40  ;;  %1962 = vmatmul.msk.f32.gmra.mxu0 %vm251_vm0, %v2437_v12 }
  0xad   : > { %1922 = vmatmul.msk.f32.gmra.mxu3 %vm251_vm0, %v2605_v40 }
  0xaf   : > { %1985 = vmatmul.msk.f32.gmra.mxu2 %vm251_vm0, %v2596_v37 }
  0xb0   : > { %v2611_v41 = vpop.f32.mrf.mxu0  ;;  %v511_v42 = vpop.f32.mrf.mxu1 }
  0xb1   : > { %v512_v6 = vadd.f32 %v511_v42, %v2656_v55 }
  0xb3   : > { %1955 = vmatmul.msk.f32.gmra.mxu1 %vm251_vm0, %v2614_v43  ;;  %1963 = vmatmul.msk.f32.gmra.mxu0 %vm251_vm0, %v2449_v14  ;;  %v2728_v14 = vpop.f32.mrf.mxu3 }
  0xb5   : > { %1923 = vmatmul.msk.f32.gmra.mxu3 %vm251_vm0, %v2614_v43 }
  0xb7   : > { %1986 = vmatmul.msk.f32.gmra.mxu2 %vm251_vm0, %v2605_v40 }
  0xb8   : > { %v2620_v44 = vpop.f32.mrf.mxu0  ;;  %v514_v45 = vpop.f32.mrf.mxu1 }
  0xb9   : > { %v515_v3 = vadd.f32 %v514_v45, %v2656_v55 }
  0xbb   : > { %1956 = vmatmul.msk.f32.gmra.mxu1 %vm251_vm0, %v2623_v46  ;;  %1964 = vmatmul.msk.f32.gmra.mxu0 %vm251_vm0, %v2461_v16 }
  0xbd   : > { %1924 = vmatmul.msk.f32.gmra.mxu3 %vm251_vm0, %v2623_v46 }
  0xbf   : > { %1987 = vmatmul.msk.f32.gmra.mxu2 %vm251_vm0, %v2614_v43 }
  0xc0   : > { %v2629_v47 = vpop.f32.mrf.mxu0  ;;  %v517_v48 = vpop.f32.mrf.mxu1 }
  0xc1   : > { %v518_v2 = vadd.f32 %v517_v48, %v2656_v55 }
  0xc3   : > { %1957 = vmatmul.msk.f32.gmra.mxu1 %vm251_vm0, %v2632_v49  ;;  %1965 = vmatmul.msk.f32.gmra.mxu0 %vm251_vm0, %v2473_v18 }
  0xc5   : > { %1925 = vmatmul.msk.f32.gmra.mxu3 %vm251_vm0, %v2632_v49 }
  0xc7   : > { %1988 = vmatmul.msk.f32.gmra.mxu2 %vm251_vm0, %v2623_v46 }
  0xc8   : > { %v2638_v50 = vpop.f32.mrf.mxu0  ;;  %v520_v51 = vpop.f32.mrf.mxu1 }
  0xc9   : > { %v521_v63 = vadd.f32 %v520_v51, %v2656_v55  ;;  %v2743_v51 = vpop.f32.mrf.mxu3 }
  0xcb   : > { %1958 = vmatmul.msk.f32.gmra.mxu1 %vm251_vm0, %v2641_v52  ;;  %1966 = vmatmul.msk.f32.gmra.mxu0 %vm251_vm0, %v2485_v20 }
  0xcd   : > { %1926 = vmatmul.msk.f32.gmra.mxu3 %vm251_vm0, %v2641_v52 }
  0xcf   : > { %1989 = vmatmul.msk.f32.gmra.mxu2 %vm251_vm0, %v2632_v49 }
  0xd0   : > { %v2658_v56 = vpop.f32.mrf.mxu0  ;;  %v523_v57 = vpop.f32.mrf.mxu1 }
  0xd1   : > { %v524_v60 = vadd.f32 %v523_v57, %v2656_v55  ;;  %v2752_v57 = vpop.f32.mrf.mxu3 }
  0xd3   : > { %1959 = vmatmul.msk.f32.gmra.mxu1 %vm251_vm0, %v2661_v58  ;;  %751 = vmatpush.xpose.msrb.mxu3 %v524_v60 }
  0xd4   : > { %1967 = vmatmul.msk.f32.gmra.mxu0 %vm251_vm0, %v2497_v22 }
  0xd5   : > { %1927 = vmatmul.msk.f32.gmra.mxu3 %vm251_vm0, %v2661_v58 }
  0xd7   : > { %752 = vmatpush.xpose.msrb.mxu3 %v521_v63  ;;  %1990 = vmatmul.msk.f32.gmra.mxu2 %vm251_vm0, %v2641_v52 }
  0xd8   : > { %v2680_v0 = vpop.f32.mrf.mxu0  ;;  %v2682_v1 = vpop.f32.mrf.mxu1 }
  0xd9   : > { %v2758_v61 = vpop.f32.mrf.mxu3  ;;  %v479_v63 = vadd.f32 %v2680_v0, %v2656_v55 }
  0xdb   : > { %753 = vmatpush.xpose.msrb.mxu3 %v518_v2  ;;  %v2766_v2 = vperm.slane %v2648_v53, 0 }
  0xdd   : > { %v2772_v25 = vadd.f32 %v2580_v32, %v2766_v2  ;;  %v2781_v26 = vadd.f32 %v2591_v35, %v2766_v2  ;;  %v2790_v27 = vadd.f32 %v2602_v38, %v2766_v2  ;;  %v2799_v35 = vadd.f32 %v2611_v41, %v2766_v2 }
  0xde   : > { %v2808_v38 = vadd.f32 %v2620_v44, %v2766_v2  ;;  %v2817_v41 = vadd.f32 %v2629_v47, %v2766_v2  ;;  %v2830_v34 = vadd.f32 %v2638_v50, %v2766_v2  ;;  %v2843_v37 = vadd.f32 %v2658_v56, %v2766_v2 }
  0xdf   : > { %754 = vmatpush.xpose.msrb.mxu3 %v515_v3  ;;  %v2859_v40 = vadd.f32 %v2712_v13, %v2766_v2  ;;  %v2874_v43 = vadd.f32 %v2720_v33, %v2766_v2  ;;  %v2887_v46 = vadd.f32 %v2728_v14, %v2766_v2  ;;  %v2900_v49 = vadd.f32 %v2743_v51, %v2766_v2 }
  0xe0   : > { %v481_v4 = vpop.f32.mrf.mxu0  ;;  %v2690_v5 = vpop.f32.mrf.mxu1  ;;  %1991 = vmatmul.msk.f32.gmra.mxu2 %vm251_vm0, %v2661_v58  ;;  %v2913_v52 = vadd.f32 %v2752_v57, %v2766_v2 }
  0xe1   : > { %v482_v24 = vadd.f32 %v481_v4, %v2656_v55  ;;  %v2774_v3 = vpop.f32.mrf.mxu3  ;;  %v530_v14 = vadd.f32 %v2690_v5, %v2656_v55  ;;  %v2916_v5 = vperm.slane %v2648_v53, 2  ;;  %v2927_v53 = vadd.f32 %v2758_v61, %v2766_v2 }
  0xe3   : > { %755 = vmatpush.xpose.msrb.mxu3 %v512_v6 }
  0xe7   : > { %756 = vmatpush.xpose.msrb.mxu3 %v509_v7 }
  0xe8   : > { %v484_v8 = vpop.f32.mrf.mxu0  ;;  %v2698_v9 = vpop.f32.mrf.mxu1 }
  0xe9   : > { %v485_v60 = vadd.f32 %v484_v8, %v2656_v55  ;;  %v2783_v6 = vpop.f32.mrf.mxu3 }
  0xeb   : > { %757 = vmatpush.xpose.msrb.mxu3 %v506_v11 }
  0xef   : > { %758 = vmatpush.xpose.msrb.mxu3 %v503_v10  ;;  %v2823_v10 = vpop.f32.mrf.mxu2 }
  0xf0   : > { %v487_v39 = vpop.f32.mrf.mxu0  ;;  %v2708_v42 = vpop.f32.mrf.mxu1 }
  0xf1   : > { %v488_v22 = vadd.f32 %v487_v39, %v2656_v55  ;;  %v2793_v28 = vpop.f32.mrf.mxu3 }
  0xf8   : > { %v490_v12 = vpop.f32.mrf.mxu0  ;;  %v2716_v36 = vpop.f32.mrf.mxu1 }
  0xf9   : > { %v491_v23 = vadd.f32 %v490_v12, %v2656_v55  ;;  %v2802_v29 = vpop.f32.mrf.mxu3 }
 0x100   : > { %v493_v15 = vpop.f32.mrf.mxu0  ;;  %v2724_v45 = vpop.f32.mrf.mxu1 }
 0x101   : > { %v494_v54 = vadd.f32 %v493_v15, %v2656_v55  ;;  %v2819_v31 = vpop.f32.mrf.mxu3  ;;  %v2836_v15 = vpop.f32.mrf.mxu2  ;;  %v542_v13 = vadd.f32 %v2724_v45, %v2656_v55  ;;  %v536_v45 = vadd.f32 %v2708_v42, %v2656_v55 }
 0x102   : > { %v619_v61 = vadd.f32 %v2836_v15, %v2916_v5 }
 0x108   : > { %v496_v17 = vpop.f32.mrf.mxu0  ;;  %v2732_v48 = vpop.f32.mrf.mxu1 }
 0x109   : > { %v497_v21 = vadd.f32 %v496_v17, %v2656_v55  ;;  %v2833_v12 = vpop.f32.mrf.mxu3 }
 0x110   : > { %v499_v16 = vpop.f32.mrf.mxu0  ;;  %v2738_v19 = vpop.f32.mrf.mxu1 }
 0x111   : > { %v500_v18 = vadd.f32 %v499_v16, %v2656_v55  ;;  %v548_v56 = vadd.f32 %v2738_v19, %v2656_v55 }
 0x113   : > { %759 = vmatpush.xpose.msrb.mxu3 %v500_v18  ;;  %v2849_v18 = vpop.f32.mrf.mxu2 }
 0x117   : > { %760 = vmatpush.xpose.msrb.mxu3 %v497_v21  ;;  %v2851_v21 = vpop.f32.mrf.mxu3 }
 0x118   : > { %v2749_v20 = vpop.f32.mrf.mxu1  ;;  %v2846_v16 = vpop.f32.mrf.mxu0 }
 0x11b   : > { %761 = vmatpush.xpose.msrb.mxu3 %v494_v54  ;;  %v551_v54 = vadd.f32 %v2749_v20, %v2656_v55  ;;  %v545_v20 = vadd.f32 %v2732_v48, %v2656_v55  ;;  %v539_v48 = vadd.f32 %v2716_v36, %v2656_v55  ;;  %v533_v36 = vadd.f32 %v2698_v9, %v2656_v55 }
 0x11c   : > { %v527_v9 = vadd.f32 %v2682_v1, %v2656_v55 }
 0x11f   : > { %762 = vmatpush.xpose.msrb.mxu3 %v491_v23 }
 0x120   : > { %v553_v59 = vpop.f32.mrf.mxu1  ;;  %v2863_v23 = vpop.f32.mrf.mxu0 }
 0x121   : > { %v554_v50 = vadd.f32 %v553_v59, %v2656_v55  ;;  %v2868_v59 = vpop.f32.mrf.mxu3 }
 0x123   : > { %763 = vmatpush.xpose.msrb.mxu3 %v488_v22  ;;  %v624_v22 = vpop.f32.mrf.mxu2 }
 0x127   : > { %764 = vmatpush.xpose.msrb.mxu3 %v485_v60 }
 0x128   : > { %v556_v62 = vpop.f32.mrf.mxu1  ;;  %v2878_v19 = vpop.f32.mrf.mxu0 }
 0x129   : > { %v557_v17 = vadd.f32 %v556_v62, %v2656_v55  ;;  %v2889_v33 = vpop.f32.mrf.mxu3 }
 0x12b   : > { %765 = vmatpush.xpose.msrb.mxu3 %v482_v24  ;;  %v627_v60 = vpop.f32.mrf.mxu2 }
 0x12c   : > { %v628_v57 = vadd.f32 %v627_v60, %v2916_v5 }
 0x12f   : > { %766 = vmatpush.xpose.msrb.mxu3 %v479_v63 }
 0x130   : > { %v559_v4 = vpop.f32.mrf.mxu1  ;;  %v600_v24 = vpop.f32.mrf.mxu0 }
 0x131   : > { %v560_v47 = vadd.f32 %v559_v4, %v2656_v55  ;;  %v2904_v63 = vpop.f32.mrf.mxu3 }
 0x132   : > { %767 = vmatmul.f32.vlgmr.msrb.gmra.mxu3 %v2772_v25 }
 0x133   : > { %v630_v62 = vpop.f32.mrf.mxu2 }
 0x134   : > { %v631_v58 = vadd.f32 %v630_v62, %v2916_v5 }
 0x138   : > { %v562_v0 = vpop.f32.mrf.mxu1  ;;  %v603_v42 = vpop.f32.mrf.mxu0 }
 0x139   : > { %v563_v39 = vadd.f32 %v562_v0, %v2656_v55 }
 0x13a   : > { %770 = vmatmul.f32.gmra.mxu3 %v2781_v26 }
 0x13b   : > { %v633_v4 = vpop.f32.mrf.mxu2 }
 0x13c   : > { %v634_v1 = vadd.f32 %v633_v4, %v2916_v5 }
 0x140   : > { %v565_v32 = vpop.f32.mrf.mxu1  ;;  %v606_v51 = vpop.f32.mrf.mxu0 }
 0x141   : > { %v566_v44 = vadd.f32 %v565_v32, %v2656_v55  ;;  %v607_v15 = vadd.f32 %v606_v51, %v2916_v5 }
 0x142   : > { %773 = vmatmul.f32.gmra.mxu3 %v2790_v27 }
 0x143   : > { %v636_v0 = vpop.f32.mrf.mxu2 }
 0x144   : > { %v637_v32 = vadd.f32 %v636_v0, %v2916_v5 }
 0x146   : > { %1553 = vmatpush.msrb.mxu1 %v637_v32 }
 0x148   : > { %v568_v7 = vpop.f32.mrf.mxu1  ;;  %1554 = vmatpush.msrb.mxu1 %v634_v1  ;;  %v691_v1 = vld [vmem:[%s3875_s3 + $0x20] sm:$0xff] }
 0x149   : > { %v569_v30 = vadd.f32 %v568_v7, %v2656_v55  ;;  %v609_v7 = vpop.f32.mrf.mxu0 }
 0x14a   : > { %776 = vmatmul.f32.gmra.mxu3 %v2799_v35  ;;  %1555 = vmatpush.msrb.mxu1 %v631_v58  ;;  %v692_v58 = vld [vmem:[%s3875_s3 + $0x28] sm:$0xff] }
 0x14b   : > { %v3025_v60 = vpop.f32.mrf.mxu2 }
 0x14c   : > { %1556 = vmatpush.msrb.mxu1 %v628_v57 }
 0x150   : > { %v571_v8 = vpop.f32.mrf.mxu1 }
 0x151   : > { %v572_v11 = vadd.f32 %v571_v8, %v2656_v55  ;;  %v2921_v55 = vpop.f32.mrf.mxu3  ;;  %v622_v8 = vadd.f32 %v2849_v18, %v2916_v5  ;;  %v595_v18 = vadd.f32 %v2863_v23, %v2916_v5 }
 0x152   : > { %779 = vmatmul.f32.gmra.mxu3 %v2808_v38 }
 0x153   : > { %864 = vmatpush.xpose.msrb.mxu0 %v572_v11 }
 0x157   : > { %865 = vmatpush.xpose.msrb.mxu0 %v569_v30  ;;  %v2941_v30 = vadd.f32 %v2774_v3, %v2766_v2  ;;  %v411_v3 = vadd.f32 %v2783_v6, %v2766_v2  ;;  %v414_v6 = vadd.f32 %v2793_v28, %v2766_v2 }
 0x159   : > { %v2935_v11 = vpop.f32.mrf.mxu3 }
 0x15a   : > { %782 = vmatmul.f32.gmra.mxu3 %v2817_v41 }
 0x15b   : > { %866 = vmatpush.xpose.msrb.mxu0 %v566_v44  ;;  %v612_v44 = vpop.f32.mrf.mxu0 }
 0x15f   : > { %867 = vmatpush.xpose.msrb.mxu0 %v563_v39  ;;  %v613_v39 = vadd.f32 %v612_v44, %v2916_v5 }
 0x162   : > { %785 = vmatmul.f32.gmra.mxu3 %v2830_v34 }
 0x163   : > { %868 = vmatpush.xpose.msrb.mxu0 %v560_v47  ;;  %v610_v47 = vadd.f32 %v609_v7, %v2916_v5 }
 0x167   : > { %869 = vmatpush.xpose.msrb.mxu0 %v557_v17  ;;  %v443_v17 = vpop.f32.mrf.mxu3 }
 0x16a   : > { %788 = vmatmul.f32.gmra.mxu3 %v2843_v37 }
 0x16b   : > { %870 = vmatpush.xpose.msrb.mxu0 %v554_v50  ;;  %v598_v50 = vadd.f32 %v2878_v19, %v2916_v5 }
 0x16f   : > { %871 = vmatpush.xpose.msrb.mxu0 %v551_v54  ;;  %v592_v54 = vadd.f32 %v2846_v16, %v2916_v5  ;;  %v3001_v16 = vadd.f32 %v2904_v63, %v2766_v2  ;;  %v690_v63 = vld [vmem:[%s3875_s3 + $0x18] sm:$0xff] }
 0x172   : > { %791 = vmatmul.f32.gmra.mxu3 %v2859_v40 }
 0x173   : > { %872 = vmatpush.xpose.msrb.mxu0 %v548_v56  ;;  %v446_v56 = vpop.f32.mrf.mxu3 }
 0x174   : > { %v3023_v19 = vadd.f32 %v446_v56, %v2766_v2 }
 0x177   : > { %873 = vmatpush.xpose.msrb.mxu0 %v545_v20  ;;  %v3013_v20 = vadd.f32 %v2935_v11, %v2766_v2 }
 0x17a   : > { %794 = vmatmul.f32.gmra.mxu3 %v2874_v43 }
 0x17b   : > { %874 = vmatpush.xpose.msrb.mxu0 %v542_v13  ;;  %v449_v23 = vpop.f32.mrf.mxu3 }
 0x17f   : > { %875 = vmatpush.xpose.msrb.mxu0 %v539_v48 }
 0x182   : > { %797 = vmatmul.f32.gmra.mxu3 %v2887_v46 }
 0x183   : > { %876 = vmatpush.xpose.msrb.mxu0 %v536_v45  ;;  %v452_v28 = vpop.f32.mrf.mxu3 }
 0x187   : > { %877 = vmatpush.xpose.msrb.mxu0 %v533_v36 }
 0x18a   : > { %800 = vmatmul.f32.gmra.mxu3 %v2900_v49 }
 0x18b   : > { %878 = vmatpush.xpose.msrb.mxu0 %v530_v14 }
 0x18f   : > { %879 = vmatpush.xpose.msrb.mxu0 %v527_v9 }
 0x192   : > { %803 = vmatmul.f32.gmra.mxu3 %v2913_v52  ;;  %880 = vmatmul.f32.vlgmr.msrb.gmra.mxu0 %v2772_v25  ;;  %v625_v25 = vadd.f32 %v624_v22, %v2916_v5  ;;  %v2969_v22 = vadd.f32 %v2819_v31, %v2766_v2  ;;  %v2987_v31 = vadd.f32 %v2868_v59, %v2766_v2 }
 0x194   : > { %1557 = vmatpush.msrb.mxu1 %v625_v25 }
 0x196   : > { %1558 = vmatpush.msrb.mxu1 %v622_v8 }
 0x198   : > { %1559 = vmatpush.msrb.mxu1 %v619_v61 }
 0x19a   : > { %806 = vmatmul.f32.gmra.mxu3 %v2927_v53  ;;  %883 = vmatmul.f32.gmra.mxu0 %v2781_v26  ;;  %v616_v26 = vadd.f32 %v2823_v10, %v2916_v5  ;;  %v604_v10 = vadd.f32 %v603_v42, %v2916_v5  ;;  %v689_v42 = vld [vmem:[%s3875_s3 + $0x10] sm:$0xff] }
 0x19c   : > { %1560 = vmatpush.msrb.mxu1 %v616_v26  ;;  %v694_v26 = vld [vmem:[%s3875_s3 + $0x38] sm:$0xff] }
 0x19e   : > { %1561 = vmatpush.msrb.mxu1 %v613_v39 }
 0x1a0   : > { %1562 = vmatpush.msrb.mxu1 %v610_v47 }
 0x1a2   : > { %809 = vmatmul.f32.gmra.mxu3 %v2941_v30  ;;  %886 = vmatmul.f32.gmra.mxu0 %v2790_v27  ;;  %v601_v27 = vadd.f32 %v600_v24, %v2916_v5  ;;  %v3035_v24 = vadd.f32 %v449_v23, %v2766_v2  ;;  %v698_v23 = vld [vmem:[%s3875_s3 + $0x58] sm:$0xff] }
 0x1a3   : > { %1563 = vmatpush.msrb.mxu1 %v607_v15 }
 0x1a5   : > { %1564 = vmatpush.msrb.mxu1 %v604_v10 }
 0x1a7   : > { %1565 = vmatpush.msrb.mxu1 %v601_v27  ;;  %v696_v27 = vld [vmem:[%s3875_s3 + $0x48] sm:$0xff] }
 0x1a9   : > { %1566 = vmatpush.msrb.mxu1 %v598_v50 }
 0x1aa   : > { %812 = vmatmul.f32.gmra.mxu3 %v411_v3  ;;  %889 = vmatmul.f32.gmra.mxu0 %v2799_v35  ;;  %v417_v35 = vadd.f32 %v2802_v29, %v2766_v2  ;;  %v2981_v29 = vadd.f32 %v2851_v21, %v2766_v2 }
 0x1ab   : > { %1567 = vmatpush.msrb.mxu1 %v595_v18 }
 0x1ad   : > { %1568 = vmatpush.msrb.mxu1 %v592_v54 }
 0x1b2   : > { %815 = vmatmul.f32.gmra.mxu3 %v414_v6  ;;  %892 = vmatmul.f32.gmra.mxu0 %v2808_v38  ;;  %v2975_v38 = vadd.f32 %v2833_v12, %v2766_v2  ;;  %v2995_v12 = vadd.f32 %v2889_v33, %v2766_v2  ;;  %v688_v33 = vld [vmem:[%s3875_s3 + $0x8] sm:$0xff] }
 0x1ba   : > { %818 = vmatmul.f32.gmra.mxu3 %v417_v35  ;;  %895 = vmatmul.f32.gmra.mxu0 %v2817_v41  ;;  %v455_v41 = vpop.f32.mrf.mxu3 }
 0x1bb   : > { %v3071_v57 = vadd.f32 %v455_v41, %v2766_v2 }
 0x1c2   : > { %821 = vmatmul.f32.gmra.mxu3 %v2969_v22  ;;  %898 = vmatmul.f32.gmra.mxu0 %v2830_v34  ;;  %v2989_v34 = vpop.f32.mrf.mxu3 }
 0x1c3   : > { %v3091_v39 = vadd.f32 %v2989_v34, %v2766_v2  ;;  %v699_v34 = vld [vmem:[%s3875_s3 + $0x60] sm:$0xff] }
 0x1ca   : > { %824 = vmatmul.f32.gmra.mxu3 %v2975_v38  ;;  %901 = vmatmul.f32.gmra.mxu0 %v2843_v37  ;;  %v768_v37 = vpop.f32.mrf.mxu3 }
 0x1d2   : > { %827 = vmatmul.f32.gmra.mxu3 %v2981_v29  ;;  %904 = vmatmul.f32.gmra.mxu0 %v2859_v40  ;;  %v771_v21 = vpop.f32.mrf.mxu3  ;;  %v3007_v40 = vadd.f32 %v2921_v55, %v2766_v2 }
 0x1d3   : > { %v3055_v51 = vadd.f32 %v771_v21, %v689_v42 }
 0x1da   : > { %830 = vmatmul.f32.gmra.mxu3 %v2987_v31  ;;  %907 = vmatmul.f32.gmra.mxu0 %v2874_v43  ;;  %v774_v59 = vpop.f32.mrf.mxu3  ;;  %v3018_v43 = vadd.f32 %v443_v17, %v2766_v2 }
 0x1db   : > { %v3073_v7 = vadd.f32 %v774_v59, %v691_v1 }
 0x1e2   : > { %833 = vmatmul.f32.gmra.mxu3 %v2995_v12  ;;  %910 = vmatmul.f32.gmra.mxu0 %v2887_v46  ;;  %v777_v13 = vpop.f32.mrf.mxu3  ;;  %v687_v46 = vld [vmem:[%s3875_s3] sm:$0xff] }
 0x1e3   : > { %v3037_v62 = vadd.f32 %v768_v37, %v687_v46  ;;  %v700_v37 = vld [vmem:[%s3875_s3 + $0x68] sm:$0xff]  ;;  %v701_v46 = vld [vmem:[%s3875_s3 + $0x70] sm:$0xff] }
 0x1ea   : > { %836 = vmatmul.f32.gmra.mxu3 %v3001_v16  ;;  %913 = vmatmul.f32.gmra.mxu0 %v2900_v49  ;;  %v780_v48 = vpop.f32.mrf.mxu3  ;;  %v3041_v49 = vpop.f32.mrf.mxu2 }
 0x1f2   : > { %839 = vmatmul.f32.gmra.mxu3 %v3007_v40  ;;  %916 = vmatmul.f32.gmra.mxu0 %v2913_v52  ;;  %v783_v4 = vpop.f32.mrf.mxu3  ;;  %v3053_v52 = vadd.f32 %v452_v28, %v2766_v2  ;;  %v3059_v32 = vpop.f32.mrf.mxu2  ;;  %v695_v2 = vld [vmem:[%s3875_s3 + $0x40] sm:$0xff] }
 0x1f3   : > { %v3109_v18 = vadd.f32 %v780_v48, %v695_v2 }
 0x1fa   : > { %842 = vmatmul.f32.gmra.mxu3 %v3013_v20  ;;  %919 = vmatmul.f32.gmra.mxu0 %v2927_v53  ;;  %v786_v25 = vpop.f32.mrf.mxu3  ;;  %v3077_v11 = vpop.f32.mrf.mxu2 }
 0x1fb   : > { %v3139_v59 = vadd.f32 %v786_v25, %v699_v34 }
 0x202   : > { %845 = vmatmul.f32.gmra.mxu3 %v3018_v43  ;;  %922 = vmatmul.f32.gmra.mxu0 %v2941_v30  ;;  %v693_v30 = vld [vmem:[%s3875_s3 + $0x30] sm:$0xff]  ;;  %v789_v17 = vpop.f32.mrf.mxu3 }
 0x203   : > { %v3093_v47 = vadd.f32 %v777_v13, %v693_v30 }
 0x20a   : > { %848 = vmatmul.f32.gmra.mxu3 %v3023_v19  ;;  %925 = vmatmul.f32.gmra.mxu0 %v411_v3  ;;  %v3097_v3 = vpop.f32.mrf.mxu2  ;;  %v792_v30 = vpop.f32.mrf.mxu3 }
 0x20f   : > { %v881_v45 = vpop.f32.mrf.mxu0 }
 0x210   : > { %v3039_v36 = vadd.f32 %v881_v45, %v688_v33  ;;  %v702_v33 = vld [vmem:[%s3875_s3 + $0x78] sm:$0xff] }
 0x212   : > { %851 = vmatmul.f32.gmra.mxu3 %v3035_v24  ;;  %928 = vmatmul.f32.gmra.mxu0 %v414_v6  ;;  %v977_v14 = vmax.f32 %v3037_v62, %v3039_v36  ;;  %v3113_v54 = vpop.f32.mrf.mxu2 }
 0x214   : > { %978 = vmax.xlane.f32.xlu0 %v977_v14  ;;  %v3154_v14 = vadd.f32 %v789_v17, %v701_v46 }
 0x217   : > { %v884_v9 = vpop.f32.mrf.mxu0 }
 0x218   : > { %v3057_v0 = vadd.f32 %v884_v9, %v690_v63 }
 0x21a   : > { %854 = vmatmul.f32.gmra.mxu3 %v3053_v52  ;;  %931 = vmatmul.f32.gmra.mxu0 %v417_v35  ;;  %v980_v55 = vmax.f32 %v3055_v51, %v3057_v0  ;;  %v697_v35 = vld [vmem:[%s3875_s3 + $0x50] sm:$0xff]  ;;  %v3128_v41 = vpop.f32.mrf.mxu2 }
 0x21b   : > { %v3124_v28 = vadd.f32 %v783_v4, %v697_v35  ;;  %v795_v35 = vpop.f32.mrf.mxu3 }
 0x21c   : > { %981 = vmax.xlane.f32.xlu0 %v980_v55 }
 0x21f   : > { %v887_v53 = vpop.f32.mrf.mxu0 }
 0x220   : > { %v3075_v8 = vadd.f32 %v887_v53, %v692_v58 }
 0x222   : > { %857 = vmatmul.f32.gmra.mxu3 %v3071_v57  ;;  %934 = vmatmul.f32.gmra.mxu0 %v2969_v22  ;;  %v983_v61 = vmax.f32 %v3073_v7, %v3075_v8  ;;  %v3143_v48 = vpop.f32.mrf.mxu2 }
 0x224   : > { %984 = vmax.xlane.f32.xlu1 %v983_v61 }
 0x227   : > { %v890_v44 = vpop.f32.mrf.mxu0 }
 0x228   : > { %v3095_v15 = vadd.f32 %v890_v44, %v694_v26 }
 0x22a   : > { %860 = vmatmul.f32.gmra.mxu3 %v3091_v39  ;;  %937 = vmatmul.f32.gmra.mxu0 %v2975_v38  ;;  %v986_v10 = vmax.f32 %v3093_v47, %v3095_v15  ;;  %v663_v63 = vpop.f32.mrf.mxu2 }
 0x22c   : > { %987 = vmax.xlane.f32.xlu1 %v986_v10 }
 0x22f   : > { %v893_v50 = vpop.f32.mrf.mxu0 }
 0x230   : > { %v3111_v6 = vadd.f32 %v893_v50, %v696_v27 }
 0x232   : > { %940 = vmatmul.f32.gmra.mxu0 %v2981_v29  ;;  %v989_v56 = vmax.f32 %v3109_v18, %v3111_v6  ;;  %v666_v4 = vpop.f32.mrf.mxu2 }
 0x234   : > { %990 = vmax.xlane.f32.xlu2 %v989_v56 }
 0x237   : > { %v896_v22 = vpop.f32.mrf.mxu0 }
 0x238   : > { %v3126_v38 = vadd.f32 %v896_v22, %v698_v23  ;;  %v664_v22 = vadd.f32 %v663_v63, %v2916_v5 }
 0x23a   : > { %943 = vmatmul.f32.gmra.mxu0 %v2987_v31  ;;  %v992_v29 = vmax.f32 %v3124_v28, %v3126_v38  ;;  %v669_v9 = vpop.f32.mrf.mxu2 }
 0x23b   : > { %v670_v2 = vadd.f32 %v669_v9, %v2916_v5 }
 0x23c   : > { %993 = vmax.xlane.f32.xlu2 %v992_v29  ;;  %v703_v29 = vld [vmem:[%s3875_s3 + $0x80] sm:$0xff] }
 0x23d   : > { %v3203_v63 = vadd.f32 %v792_v30, %v703_v29 }
 0x23f   : > { %v899_v21 = vpop.f32.mrf.mxu0 }
 0x240   : > { %v3141_v13 = vadd.f32 %v899_v21, %v700_v37  ;;  %v661_v37 = vadd.f32 %v3143_v48, %v2916_v5  ;;  %v798_v48 = vpop.f32.mrf.mxu3 }
 0x242   : > { %946 = vmatmul.f32.gmra.mxu0 %v2995_v12  ;;  %v995_v31 = vmax.f32 %v3139_v59, %v3141_v13  ;;  %v672_v55 = vpop.f32.mrf.mxu2 }
 0x243   : > { %v673_v17 = vadd.f32 %v672_v55, %v2916_v5 }
 0x244   : > { %996 = vmax.xlane.f32.xlu0 %v995_v31 }
 0x247   : > { %v902_v45 = vpop.f32.mrf.mxu0 }
 0x248   : > { %v3156_v42 = vadd.f32 %v902_v45, %v702_v33  ;;  %v658_v33 = vadd.f32 %v3128_v41, %v2916_v5  ;;  %v706_v41 = vld [vmem:[%s3875_s3 + $0x98] sm:$0xff] }
 0x24a   : > { %949 = vmatmul.f32.gmra.mxu0 %v3001_v16  ;;  %v998_v12 = vmax.f32 %v3154_v14, %v3156_v42  ;;  %v675_v1 = vpop.f32.mrf.mxu2 }
 0x24c   : > { %999 = vmax.xlane.f32.xlu2 %v998_v12 }
 0x252   : > { %952 = vmatmul.f32.gmra.mxu0 %v3007_v40  ;;  %v678_v58 = vpop.f32.mrf.mxu2 }
 0x25a   : > { %955 = vmatmul.f32.gmra.mxu0 %v3013_v20  ;;  %v681_v16 = vpop.f32.mrf.mxu2  ;;  %v905_v20 = vpop.f32.mrf.mxu0 }
 0x25b   : > { %v682_v25 = vadd.f32 %v681_v16, %v2916_v5  ;;  %v705_v16 = vld [vmem:[%s3875_s3 + $0x90] sm:$0xff] }
 0x262   : > { %958 = vmatmul.f32.gmra.mxu0 %v3018_v43  ;;  %v684_v53 = vpop.f32.mrf.mxu2  ;;  %v908_v10 = vpop.f32.mrf.mxu0 }
 0x263   : > { %v685_v40 = vadd.f32 %v684_v53, %v2916_v5 }
 0x265   : > { %1666 = vmatpush.msrb.mxu2 %v685_v40  ;;  %v649_v40 = vadd.f32 %v3077_v11, %v2916_v5 }
 0x267   : > { %1667 = vmatpush.msrb.mxu2 %v682_v25  ;;  %v3223_v25 = vadd.f32 %v908_v10, %v706_v41 }
 0x26a   : > { %961 = vmatmul.f32.gmra.mxu0 %v3023_v19  ;;  %v911_v55 = vpop.f32.mrf.mxu0 }
 0x272   : > { %964 = vmatmul.f32.gmra.mxu0 %v3035_v24 }
 0x27a   : > { %967 = vmatmul.f32.gmra.mxu0 %v3053_v52  ;;  %v679_v52 = vadd.f32 %v678_v58, %v2916_v5  ;;  %v652_v58 = vadd.f32 %v3097_v3, %v2916_v5  ;;  %v646_v3 = vadd.f32 %v3059_v32, %v2916_v5  ;;  %v708_v32 = vld [vmem:[%s3875_s3 + $0xa8] sm:$0xff] }
 0x27c   : > { %1668 = vmatpush.msrb.mxu2 %v679_v52  ;;  %v640_v52 = vadd.f32 %v3025_v60, %v2916_v5 }
 0x282   : > { %970 = vmatmul.f32.gmra.mxu0 %v3071_v57  ;;  %v676_v57 = vadd.f32 %v675_v1, %v2916_v5  ;;  %v655_v1 = vadd.f32 %v3113_v54, %v2916_v5 }
 0x284   : > { %1669 = vmatpush.msrb.mxu2 %v676_v57  ;;  %v707_v57 = vld [vmem:[%s3875_s3 + $0xa0] sm:$0xff] }
 0x286   : > { %1670 = vmatpush.msrb.mxu2 %v673_v17 }
 0x287   : > { %v979_v61 = vpop.xlane.xlu0 %978 }
 0x288   : > { %v1073_v43 = vsub.f32 %v3037_v62, %v979_v61  ;;  %v1074_v19 = vsub.f32 %v3039_v36, %v979_v61  ;;  %1671 = vmatpush.msrb.mxu2 %v670_v2  ;;  %v3255_v2 = vadd.f32 %v798_v48, %v707_v57 }
 0x28a   : > { %v1137_v24 = vmul.f32 1.442695, %v1073_v43  ;;  %v1139_v26 = vmul.f32 1.442695, %v1074_v19  ;;  %973 = vmatmul.f32.gmra.mxu0 %v3091_v39  ;;  %v3231_v43 = vadd.f32 %v795_v35, %v705_v16 }
 0x28c   : > { %2051 = vpow2.f32 %v1137_v24 }
 0x28d   : > { %2053 = vpow2.f32 %v1139_v26  ;;  %v643_v26 = vadd.f32 %v3041_v49, %v2916_v5 }
 0x28f   : > { %v982_v44 = vpop.xlane.xlu0 %981 }
 0x290   : > { %v1075_v62 = vsub.f32 %v3055_v51, %v982_v44  ;;  %v1076_v36 = vsub.f32 %v3057_v0, %v982_v44  ;;  %v704_v51 = vld [vmem:[%s3875_s3 + $0x88] sm:$0xff]  ;;  %v667_v0 = vadd.f32 %v666_v4, %v2916_v5  ;;  %v801_v44 = vpop.f32.mrf.mxu3 }
 0x291   : > { %v3195_v21 = vadd.f32 %v905_v20, %v704_v51 }
 0x292   : > { %v3179_v39 = vpop.eup %2051  ;;  %v1141_v27 = vmul.f32 1.442695, %v1075_v62  ;;  %v1143_v50 = vmul.f32 1.442695, %v1076_v36  ;;  %1672 = vmatpush.msrb.mxu2 %v667_v0  ;;  %v3249_v62 = vadd.f32 %v911_v55, %v708_v32 }
 0x293   : > { %v3181_v56 = vpop.eup %2053 }
 0x294   : > { %2055 = vpow2.f32 %v1141_v27  ;;  %v1265_v23 = vadd.f32 %v3181_v56, %v3179_v39  ;;  %1673 = vmatpush.msrb.mxu2 %v664_v22 }
 0x295   : > { %2057 = vpow2.f32 %v1143_v50  ;;  %v1007_v50 = vmax.f32 %v3255_v2, %v3249_v62 }
 0x296   : > { %1266 = vadd.xlane.f32.xlu1 %v1265_v23  ;;  %1674 = vmatpush.msrb.mxu2 %v661_v37 }
 0x297   : > { %v985_v34 = vpop.xlane.xlu1 %984 }
 0x298   : > { %v1077_v31 = vsub.f32 %v3073_v7, %v985_v34  ;;  %v1078_v46 = vsub.f32 %v3075_v8, %v985_v34  ;;  %v1001_v7 = vmax.f32 %v3203_v63, %v3195_v21  ;;  %1675 = vmatpush.msrb.mxu2 %v658_v33  ;;  %v804_v34 = vpop.f32.mrf.mxu3 }
 0x29a   : > { %v3201_v45 = vpop.eup %2055  ;;  %v1145_v12 = vmul.f32 1.442695, %v1077_v31  ;;  %v1147_v4 = vmul.f32 1.442695, %v1078_v46  ;;  %1676 = vmatpush.msrb.mxu2 %v655_v1 }
 0x29b   : > { %v3205_v9 = vpop.eup %2057 }
 0x29c   : > { %2059 = vpow2.f32 %v1145_v12  ;;  %v1268_v8 = vadd.f32 %v3205_v9, %v3201_v45  ;;  %1677 = vmatpush.msrb.mxu2 %v652_v58 }
 0x29d   : > { %2061 = vpow2.f32 %v1147_v4 }
 0x29e   : > { %1002 = vmax.xlane.f32.xlu1 %v1001_v7  ;;  %1269 = vadd.xlane.f32.xlu0 %v1268_v8 }
 0x29f   : > { %v988_v53 = vpop.xlane.xlu1 %987  ;;  %1678 = vmatpush.msrb.mxu2 %v649_v40 }
 0x2a0   : > { %v1079_v20 = vsub.f32 %v3093_v47, %v988_v53  ;;  %v1080_v54 = vsub.f32 %v3095_v15, %v988_v53  ;;  %v1004_v47 = vmax.f32 %v3231_v43, %v3223_v25  ;;  %v914_v15 = vpop.f32.mrf.mxu0 }
 0x2a1   : > { %1679 = vmatpush.msrb.mxu2 %v646_v3 }
 0x2a2   : > { %v3229_v61 = vpop.eup %2059  ;;  %v1149_v19 = vmul.f32 1.442695, %v1079_v20  ;;  %v1151_v30 = vmul.f32 1.442695, %v1080_v54  ;;  %v807_v54 = vpop.f32.mrf.mxu3 }
 0x2a3   : > { %v3233_v24 = vpop.eup %2061  ;;  %1680 = vmatpush.msrb.mxu2 %v643_v26 }
 0x2a4   : > { %2063 = vpow2.f32 %v1149_v19  ;;  %v1271_v11 = vadd.f32 %v3233_v24, %v3229_v61 }
 0x2a5   : > { %2065 = vpow2.f32 %v1151_v30  ;;  %1681 = vmatpush.msrb.mxu2 %v640_v52 }
 0x2a6   : > { %1272 = vadd.xlane.f32.xlu2 %v1271_v11  ;;  %1005 = vmax.xlane.f32.xlu0 %v1004_v47 }
 0x2a7   : > { %v991_v17 = vpop.xlane.xlu2 %990 }
 0x2a8   : > { %v1081_v36 = vsub.f32 %v3109_v18, %v991_v17  ;;  %v1082_v10 = vsub.f32 %v3111_v6, %v991_v17  ;;  %v710_v18 = vld [vmem:[%s3875_s3 + $0xb8] sm:$0xff]  ;;  %v709_v6 = vld [vmem:[%s3875_s3 + $0xb0] sm:$0xff]  ;;  %v917_v23 = vpop.f32.mrf.mxu0 }
 0x2a9   : > { %v3269_v0 = vadd.f32 %v914_v15, %v710_v18  ;;  %v3275_v31 = vadd.f32 %v801_v44, %v709_v6 }
 0x2aa   : > { %v3253_v49 = vpop.eup %2063  ;;  %v1153_v5 = vmul.f32 1.442695, %v1081_v36  ;;  %v1155_v60 = vmul.f32 1.442695, %v1082_v10 }
 0x2ab   : > { %v3257_v27 = vpop.eup %2065  ;;  %v1010_v4 = vmax.f32 %v3275_v31, %v3269_v0 }
 0x2ac   : > { %2067 = vpow2.f32 %v1153_v5  ;;  %v1274_v35 = vadd.f32 %v3257_v27, %v3253_v49  ;;  %v810_v5 = vpop.f32.mrf.mxu3 }
 0x2ad   : > { %2069 = vpow2.f32 %v1155_v60 }
 0x2ae   : > { %1008 = vmax.xlane.f32.xlu2 %v1007_v50  ;;  %1275 = vadd.xlane.f32.xlu1 %v1274_v35 }
 0x2af   : > { %v994_v51 = vpop.xlane.xlu2 %993 }
 0x2b0   : > { %v1083_v22 = vsub.f32 %v3124_v28, %v994_v51  ;;  %v1084_v29 = vsub.f32 %v3126_v38, %v994_v51  ;;  %v712_v28 = vld [vmem:[%s3875_s3 + $0xc8] sm:$0xff]  ;;  %v711_v38 = vld [vmem:[%s3875_s3 + $0xc0] sm:$0xff]  ;;  %v920_v1 = vpop.f32.mrf.mxu0  ;;  %v718_v51 = vld [vmem:[%s3875_s3 + $0xf8] sm:$0xff] }
 0x2b1   : > { %v3289_v8 = vadd.f32 %v917_v23, %v712_v28  ;;  %v3295_v16 = vadd.f32 %v804_v34, %v711_v38 }
 0x2b2   : > { %v3273_v37 = vpop.eup %2067  ;;  %v1157_v46 = vmul.f32 1.442695, %v1083_v22  ;;  %v1159_v33 = vmul.f32 1.442695, %v1084_v29  ;;  %v717_v29 = vld [vmem:[%s3875_s3 + $0xf0] sm:$0xff] }
 0x2b3   : > { %v3277_v12 = vpop.eup %2069  ;;  %v1013_v19 = vmax.f32 %v3295_v16, %v3289_v8 }
 0x2b4   : > { %2071 = vpow2.f32 %v1157_v46  ;;  %v1277_v55 = vadd.f32 %v3277_v12, %v3273_v37  ;;  %v813_v34 = vpop.f32.mrf.mxu3 }
 0x2b5   : > { %2073 = vpow2.f32 %v1159_v33  ;;  %v3349_v33 = vadd.f32 %v813_v34, %v717_v29 }
 0x2b6   : > { %1011 = vmax.xlane.f32.xlu1 %v1010_v4  ;;  %1278 = vadd.xlane.f32.xlu0 %v1277_v55 }
 0x2b7   : > { %v997_v7 = vpop.xlane.xlu0 %996 }
 0x2b8   : > { %v1085_v48 = vsub.f32 %v3139_v59, %v997_v7  ;;  %v1086_v41 = vsub.f32 %v3141_v13, %v997_v7  ;;  %v714_v59 = vld [vmem:[%s3875_s3 + $0xd8] sm:$0xff]  ;;  %v713_v13 = vld [vmem:[%s3875_s3 + $0xd0] sm:$0xff]  ;;  %v923_v17 = vpop.f32.mrf.mxu0 }
 0x2b9   : > { %v3309_v11 = vadd.f32 %v920_v1, %v714_v59  ;;  %v3315_v26 = vadd.f32 %v807_v54, %v713_v13 }
 0x2ba   : > { %v3293_v58 = vpop.eup %2071  ;;  %v1161_v53 = vmul.f32 1.442695, %v1085_v48  ;;  %v1163_v40 = vmul.f32 1.442695, %v1086_v41 }
 0x2bb   : > { %v3297_v20 = vpop.eup %2073  ;;  %v1016_v36 = vmax.f32 %v3315_v26, %v3309_v11 }
 0x2bc   : > { %2075 = vpow2.f32 %v1161_v53  ;;  %v1280_v3 = vadd.f32 %v3297_v20, %v3293_v58  ;;  %v816_v1 = vpop.f32.mrf.mxu3 }
 0x2bd   : > { %2077 = vpow2.f32 %v1163_v40 }
 0x2be   : > { %1281 = vadd.xlane.f32.xlu2 %v1280_v3  ;;  %1014 = vmax.xlane.f32.xlu0 %v1013_v19 }
 0x2bf   : > { %v1000_v30 = vpop.xlane.xlu2 %999 }
 0x2c0   : > { %v1087_v47 = vsub.f32 %v3154_v14, %v1000_v30  ;;  %v1088_v32 = vsub.f32 %v3156_v42, %v1000_v30  ;;  %v716_v14 = vld [vmem:[%s3875_s3 + $0xe8] sm:$0xff]  ;;  %v715_v42 = vld [vmem:[%s3875_s3 + $0xe0] sm:$0xff]  ;;  %v926_v22 = vpop.f32.mrf.mxu0 }
 0x2c1   : > { %v3329_v60 = vadd.f32 %v923_v17, %v716_v14  ;;  %v3333_v35 = vadd.f32 %v810_v5, %v715_v42  ;;  %v3347_v46 = vadd.f32 %v926_v22, %v718_v51  ;;  %v719_v22 = vld [vmem:[%s3875_s3 + $0x100] sm:$0xff] }
 0x2c2   : > { %v3313_v15 = vpop.eup %2075  ;;  %v1165_v52 = vmul.f32 1.442695, %v1087_v47  ;;  %v1167_v57 = vmul.f32 1.442695, %v1088_v32 }
 0x2c3   : > { %v3317_v44 = vpop.eup %2077  ;;  %v1019_v23 = vmax.f32 %v3333_v35, %v3329_v60  ;;  %v1022_v4 = vmax.f32 %v3349_v33, %v3347_v46 }
 0x2c4   : > { %2079 = vpow2.f32 %v1165_v52  ;;  %v1283_v10 = vadd.f32 %v3317_v44, %v3313_v15  ;;  %v819_v5 = vpop.f32.mrf.mxu3 }
 0x2c5   : > { %2081 = vpow2.f32 %v1167_v57 }
 0x2c6   : > { %1017 = vmax.xlane.f32.xlu2 %v1016_v36  ;;  %1284 = vadd.xlane.f32.xlu1 %v1283_v10 }
 0x2c8   : > { %v929_v38 = vpop.f32.mrf.mxu0 }
 0x2ca   : > { %v3331_v50 = vpop.eup %2079 }
 0x2cb   : > { %v3335_v18 = vpop.eup %2081 }
 0x2cc   : > { %v1286_v6 = vadd.f32 %v3335_v18, %v3331_v50 }
 0x2ce   : > { %1287 = vadd.xlane.f32.xlu0 %v1286_v6  ;;  %1020 = vmax.xlane.f32.xlu1 %v1019_v23  ;;  %v720_v23 = vld [vmem:[%s3875_s3 + $0x108] sm:$0xff] }
 0x2d6   : > { %1023 = vmax.xlane.f32.xlu0 %v1022_v4 }
 0x309   : > { %v1267_v55 = vpop.xlane.xlu1 %1266 }
 0x30a   : > { %2083 = vrcp.f32 %v1267_v55 }
 0x310   : > { %v2084_v28 = vpop.eup %2083 }
 0x311   : > { %v1393_v7 = vmul.f32 %v2084_v28, %v1267_v55  ;;  %v1003_v48 = vpop.xlane.xlu1 %1002  ;;  %v1270_v41 = vpop.xlane.xlu0 %1269  ;;  %v3373_v55 = vadd.f32 %v929_v38, %v720_v23 }
 0x312   : > { %v1089_v53 = vsub.f32 %v3203_v63, %v1003_v48  ;;  %v1090_v40 = vsub.f32 %v3195_v21, %v1003_v48  ;;  %2085 = vrcp.f32 %v1270_v41  ;;  %v932_v63 = vpop.f32.mrf.mxu0  ;;  %v3379_v48 = vadd.f32 %v816_v1, %v719_v22  ;;  %v723_v22 = vld [vmem:[%s3875_s3 + $0x120] sm:$0xff] }
 0x313   : > { %v1425_v54 = vsub.f32 2.0, %v1393_v7 }
 0x314   : > { %v1169_v3 = vmul.f32 1.442695, %v1089_v53  ;;  %v1171_v19 = vmul.f32 1.442695, %v1090_v40  ;;  %v1025_v38 = vmax.f32 %v3379_v48, %v3373_v55 }
 0x315   : > { %v1457_v59 = vmul.f32 %v2084_v28, %v1425_v54 }
 0x316   : > { %2087 = vpow2.f32 %v1169_v3 }
 0x317   : > { %v1489_v13 = vmul.f32 %v3179_v39, %v1457_v59  ;;  %v1490_v30 = vmul.f32 %v3181_v56, %v1457_v59  ;;  %2089 = vpow2.f32 %v1171_v19  ;;  %v822_v19 = vpop.f32.mrf.mxu3 }
 0x318   : > { %v2086_v47 = vpop.eup %2085 }
 0x319   : > { %v1394_v32 = vmul.f32 %v2086_v47, %v1270_v41  ;;  %v1273_v52 = vpop.xlane.xlu2 %1272  ;;  %1569 = vmatmul.f32.vlgmr.msrb.gmra.mxu1 %v1489_v13  ;;  %1682 = vmatmul.f32.vlgmr.msrb.gmra.mxu2 %v1490_v30  ;;  %v1006_v57 = vpop.xlane.xlu0 %1005  ;;  %v721_v30 = vld [vmem:[%s3875_s3 + $0x110] sm:$0xff] }
 0x31a   : > { %2091 = vrcp.f32 %v1273_v52  ;;  %v1091_v21 = vsub.f32 %v3231_v43, %v1006_v57  ;;  %v1092_v17 = vsub.f32 %v3223_v25, %v1006_v57  ;;  %v935_v41 = vpop.f32.mrf.mxu0 }
 0x31b   : > { %v1426_v36 = vsub.f32 2.0, %v1394_v32 }
 0x31c   : > { %v3359_v10 = vpop.eup %2087  ;;  %v1173_v39 = vmul.f32 1.442695, %v1091_v21  ;;  %v1175_v14 = vmul.f32 1.442695, %v1092_v17 }
 0x31d   : > { %v3361_v56 = vpop.eup %2089  ;;  %v1458_v42 = vmul.f32 %v2086_v47, %v1426_v36  ;;  %v3401_v36 = vadd.f32 %v819_v5, %v721_v30 }
 0x31e   : > { %2093 = vpow2.f32 %v1173_v39  ;;  %v1289_v6 = vadd.f32 %v3361_v56, %v3359_v10 }
 0x31f   : > { %2095 = vpow2.f32 %v1175_v14  ;;  %v1491_v25 = vmul.f32 %v3201_v45, %v1458_v42  ;;  %v1492_v43 = vmul.f32 %v3205_v9, %v1458_v42 }
 0x320   : > { %v2092_v51 = vpop.eup %2091  ;;  %1290 = vadd.xlane.f32.xlu2 %v1289_v6 }
 0x321   : > { %v1395_v29 = vmul.f32 %v2092_v51, %v1273_v52  ;;  %v1009_v34 = vpop.xlane.xlu2 %1008  ;;  %v1276_v4 = vpop.xlane.xlu1 %1275  ;;  %1572 = vmatmul.f32.gmra.mxu1 %v1491_v25  ;;  %1685 = vmatmul.f32.gmra.mxu2 %v1492_v43 }
 0x322   : > { %v1093_v28 = vsub.f32 %v3255_v2, %v1009_v34  ;;  %v1094_v7 = vsub.f32 %v3249_v62, %v1009_v34  ;;  %2097 = vrcp.f32 %v1276_v4  ;;  %v722_v2 = vld [vmem:[%s3875_s3 + $0x118] sm:$0xff]  ;;  %v938_v23 = vpop.f32.mrf.mxu0 }
 0x323   : > { %v1427_v45 = vsub.f32 2.0, %v1395_v29  ;;  %v3395_v57 = vadd.f32 %v932_v63, %v722_v2 }
 0x324   : > { %v3377_v9 = vpop.eup %2093  ;;  %v1177_v53 = vmul.f32 1.442695, %v1093_v28  ;;  %v1179_v40 = vmul.f32 1.442695, %v1094_v7 }
 0x325   : > { %v3381_v54 = vpop.eup %2095  ;;  %v1459_v3 = vmul.f32 %v2092_v51, %v1427_v45  ;;  %v825_v51 = vpop.f32.mrf.mxu3 }
 0x326   : > { %2099 = vpow2.f32 %v1177_v53  ;;  %v1292_v62 = vadd.f32 %v3381_v54, %v3377_v9  ;;  %v3423_v53 = vadd.f32 %v822_v19, %v723_v22 }
 0x327   : > { %2101 = vpow2.f32 %v1179_v40  ;;  %v1493_v1 = vmul.f32 %v3229_v61, %v1459_v3  ;;  %v1494_v59 = vmul.f32 %v3233_v24, %v1459_v3 }
 0x328   : > { %v2098_v13 = vpop.eup %2097  ;;  %1026 = vmax.xlane.f32.xlu2 %v1025_v38  ;;  %1293 = vadd.xlane.f32.xlu1 %v1292_v62 }
 0x329   : > { %v1396_v47 = vmul.f32 %v2098_v13, %v1276_v4  ;;  %v1012_v32 = vpop.xlane.xlu1 %1011  ;;  %1575 = vmatmul.f32.gmra.mxu1 %v1493_v1  ;;  %1688 = vmatmul.f32.gmra.mxu2 %v1494_v59  ;;  %v1279_v52 = vpop.xlane.xlu0 %1278 }
 0x32a   : > { %v1095_v21 = vsub.f32 %v3275_v31, %v1012_v32  ;;  %v1096_v61 = vsub.f32 %v3269_v0, %v1012_v32  ;;  %2103 = vrcp.f32 %v1279_v52  ;;  %v1028_v31 = vmax.f32 %v3401_v36, %v3395_v57  ;;  %v724_v0 = vld [vmem:[%s3875_s3 + $0x128] sm:$0xff]  ;;  %v941_v59 = vpop.f32.mrf.mxu0 }
 0x32b   : > { %v1428_v24 = vsub.f32 2.0, %v1396_v47  ;;  %v3417_v28 = vadd.f32 %v935_v41, %v724_v0 }
 0x32c   : > { %v3399_v17 = vpop.eup %2099  ;;  %v1181_v39 = vmul.f32 1.442695, %v1095_v21  ;;  %v1183_v14 = vmul.f32 1.442695, %v1096_v61 }
 0x32d   : > { %v3403_v42 = vpop.eup %2101  ;;  %v1460_v6 = vmul.f32 %v2098_v13, %v1428_v24  ;;  %v1031_v2 = vmax.f32 %v3423_v53, %v3417_v28  ;;  %v725_v13 = vld [vmem:[%s3875_s3 + $0x130] sm:$0xff] }
 0x32e   : > { %2105 = vpow2.f32 %v1181_v39  ;;  %v1295_v63 = vadd.f32 %v3403_v42, %v3399_v17  ;;  %v3445_v39 = vadd.f32 %v825_v51, %v725_v13 }
 0x32f   : > { %2107 = vpow2.f32 %v1183_v14  ;;  %v1495_v5 = vmul.f32 %v3253_v49, %v1460_v6  ;;  %v1496_v25 = vmul.f32 %v3257_v27, %v1460_v6 }
 0x330   : > { %v2104_v43 = vpop.eup %2103  ;;  %1296 = vadd.xlane.f32.xlu0 %v1295_v63  ;;  %1029 = vmax.xlane.f32.xlu1 %v1028_v31 }
 0x331   : > { %v1397_v29 = vmul.f32 %v2104_v43, %v1279_v52  ;;  %v1282_v34 = vpop.xlane.xlu2 %1281  ;;  %1578 = vmatmul.f32.gmra.mxu1 %v1495_v5  ;;  %1691 = vmatmul.f32.gmra.mxu2 %v1496_v25  ;;  %v1015_v4 = vpop.xlane.xlu0 %1014 }
 0x332   : > { %2109 = vrcp.f32 %v1282_v34  ;;  %v1097_v49 = vsub.f32 %v3295_v16, %v1015_v4  ;;  %v1098_v27 = vsub.f32 %v3289_v8, %v1015_v4  ;;  %v726_v8 = vld [vmem:[%s3875_s3 + $0x138] sm:$0xff] }
 0x333   : > { %v1429_v7 = vsub.f32 2.0, %v1397_v29  ;;  %v3439_v52 = vadd.f32 %v938_v23, %v726_v8 }
 0x334   : > { %v3421_v45 = vpop.eup %2105  ;;  %v1185_v40 = vmul.f32 1.442695, %v1097_v49  ;;  %v1187_v3 = vmul.f32 1.442695, %v1098_v27 }
 0x335   : > { %v3425_v38 = vpop.eup %2107  ;;  %v1461_v62 = vmul.f32 %v2104_v43, %v1429_v7  ;;  %v1034_v23 = vmax.f32 %v3445_v39, %v3439_v52  ;;  %v727_v43 = vld [vmem:[%s3875_s3 + $0x140] sm:$0xff] }
 0x336   : > { %2111 = vpow2.f32 %v1185_v40  ;;  %v1298_v41 = vadd.f32 %v3425_v38, %v3421_v45 }
 0x337   : > { %2113 = vpow2.f32 %v1187_v3  ;;  %v1497_v16 = vmul.f32 %v3273_v37, %v1461_v62  ;;  %v1498_v19 = vmul.f32 %v3277_v12, %v1461_v62  ;;  %v828_v12 = vpop.f32.mrf.mxu3 }
 0x338   : > { %v2110_v1 = vpop.eup %2109  ;;  %1299 = vadd.xlane.f32.xlu2 %v1298_v41  ;;  %1032 = vmax.xlane.f32.xlu0 %v1031_v2  ;;  %v3467_v7 = vadd.f32 %v828_v12, %v727_v43 }
 0x339   : > { %v1398_v30 = vmul.f32 %v2110_v1, %v1282_v34  ;;  %v1018_v47 = vpop.xlane.xlu2 %1017  ;;  %v1285_v32 = vpop.xlane.xlu1 %1284  ;;  %1581 = vmatmul.f32.gmra.mxu1 %v1497_v16  ;;  %1694 = vmatmul.f32.gmra.mxu2 %v1498_v19 }
 0x33a   : > { %v1099_v21 = vsub.f32 %v3315_v26, %v1018_v47  ;;  %v1100_v37 = vsub.f32 %v3309_v11, %v1018_v47  ;;  %2115 = vrcp.f32 %v1285_v32  ;;  %v728_v11 = vld [vmem:[%s3875_s3 + $0x148] sm:$0xff] }
 0x33b   : > { %v1430_v61 = vsub.f32 2.0, %v1398_v30  ;;  %v3461_v34 = vadd.f32 %v941_v59, %v728_v11  ;;  %v729_v59 = vld [vmem:[%s3875_s3 + $0x150] sm:$0xff] }
 0x33c   : > { %v3443_v24 = vpop.eup %2111  ;;  %v1189_v14 = vmul.f32 1.442695, %v1099_v21  ;;  %v1191_v6 = vmul.f32 1.442695, %v1100_v37 }
 0x33d   : > { %v3447_v63 = vpop.eup %2113  ;;  %v1462_v31 = vmul.f32 %v2110_v1, %v1430_v61 }
 0x33e   : > { %2117 = vpow2.f32 %v1189_v14  ;;  %v1301_v26 = vadd.f32 %v3447_v63, %v3443_v24 }
 0x33f   : > { %2119 = vpow2.f32 %v1191_v6  ;;  %v1499_v0 = vmul.f32 %v3293_v58, %v1462_v31  ;;  %v1500_v5 = vmul.f32 %v3297_v20, %v1462_v31  ;;  %v944_v20 = vpop.f32.mrf.mxu0  ;;  %v831_v41 = vpop.f32.mrf.mxu3 }
 0x340   : > { %v2116_v25 = vpop.eup %2115  ;;  %1035 = vmax.xlane.f32.xlu2 %v1034_v23  ;;  %1302 = vadd.xlane.f32.xlu1 %v1301_v26 }
 0x341   : > { %v1399_v51 = vmul.f32 %v2116_v25, %v1285_v32  ;;  %v1021_v22 = vpop.xlane.xlu1 %1020  ;;  %1584 = vmatmul.f32.gmra.mxu1 %v1499_v0  ;;  %1697 = vmatmul.f32.gmra.mxu2 %v1500_v5  ;;  %v1288_v29 = vpop.xlane.xlu0 %1287  ;;  %v731_v5 = vld [vmem:[%s3875_s3 + $0x160] sm:$0xff] }
 0x342   : > { %v1101_v4 = vsub.f32 %v3333_v35, %v1021_v22  ;;  %v1102_v58 = vsub.f32 %v3329_v60, %v1021_v22  ;;  %2121 = vrcp.f32 %v1288_v29  ;;  %v1037_v60 = vmax.f32 %v3467_v7, %v3461_v34  ;;  %v730_v35 = vld [vmem:[%s3875_s3 + $0x158] sm:$0xff] }
 0x343   : > { %v1431_v49 = vsub.f32 2.0, %v1399_v51  ;;  %v3483_v47 = vadd.f32 %v944_v20, %v730_v35 }
 0x344   : > { %v3465_v27 = vpop.eup %2117  ;;  %v1193_v40 = vmul.f32 1.442695, %v1101_v4  ;;  %v1195_v3 = vmul.f32 1.442695, %v1102_v58  ;;  %v733_v58 = vld [vmem:[%s3875_s3 + $0x170] sm:$0xff] }
 0x345   : > { %v3469_v62 = vpop.eup %2119  ;;  %v1463_v2 = vmul.f32 %v2116_v25, %v1431_v49 }
 0x346   : > { %2123 = vpow2.f32 %v1193_v40  ;;  %v1304_v8 = vadd.f32 %v3469_v62, %v3465_v27 }
 0x347   : > { %2125 = vpow2.f32 %v1195_v3  ;;  %v1501_v16 = vmul.f32 %v3313_v15, %v1463_v2  ;;  %v1502_v19 = vmul.f32 %v3317_v44, %v1463_v2  ;;  %v3489_v44 = vadd.f32 %v831_v41, %v729_v59  ;;  %v947_v6 = vpop.f32.mrf.mxu0  ;;  %v834_v26 = vpop.f32.mrf.mxu3 }
 0x348   : > { %v2122_v1 = vpop.eup %2121  ;;  %1305 = vadd.xlane.f32.xlu0 %v1304_v8  ;;  %1038 = vmax.xlane.f32.xlu1 %v1037_v60  ;;  %v3509_v51 = vadd.f32 %v834_v26, %v731_v5 }
 0x349   : > { %v1400_v13 = vmul.f32 %v2122_v1, %v1288_v29  ;;  %1587 = vmatmul.f32.gmra.mxu1 %v1501_v16  ;;  %1700 = vmatmul.f32.gmra.mxu2 %v1502_v19  ;;  %v1024_v30 = vpop.xlane.xlu0 %1023  ;;  %v1040_v23 = vmax.f32 %v3489_v44, %v3483_v47  ;;  %v734_v29 = vld [vmem:[%s3875_s3 + $0x178] sm:$0xff] }
 0x34a   : > { %v1103_v32 = vsub.f32 %v3349_v33, %v1024_v30  ;;  %v1104_v21 = vsub.f32 %v3347_v46, %v1024_v30  ;;  %v732_v46 = vld [vmem:[%s3875_s3 + $0x168] sm:$0xff] }
 0x34b   : > { %v1432_v15 = vsub.f32 2.0, %v1400_v13  ;;  %v3505_v25 = vadd.f32 %v947_v6, %v732_v46 }
 0x34c   : > { %v3487_v37 = vpop.eup %2123  ;;  %v1197_v12 = vmul.f32 1.442695, %v1103_v32  ;;  %v1199_v61 = vmul.f32 1.442695, %v1104_v21 }
 0x34d   : > { %v3491_v14 = vpop.eup %2125  ;;  %v1464_v31 = vmul.f32 %v2122_v1, %v1432_v15 }
 0x34e   : > { %2127 = vpow2.f32 %v1197_v12  ;;  %v1307_v33 = vadd.f32 %v3491_v14, %v3487_v37 }
 0x34f   : > { %2129 = vpow2.f32 %v1199_v61  ;;  %v1503_v11 = vmul.f32 %v3331_v50, %v1464_v31  ;;  %v1504_v0 = vmul.f32 %v3335_v18, %v1464_v31  ;;  %v1043_v50 = vmax.f32 %v3509_v51, %v3505_v25  ;;  %v950_v4 = vpop.f32.mrf.mxu0  ;;  %v837_v20 = vpop.f32.mrf.mxu3 }
 0x350   : > { %1041 = vmax.xlane.f32.xlu0 %v1040_v23  ;;  %1308 = vadd.xlane.f32.xlu2 %v1307_v33  ;;  %v3523_v49 = vadd.f32 %v950_v4, %v734_v29  ;;  %v3525_v40 = vadd.f32 %v837_v20, %v733_v58 }
 0x351   : > { %1590 = vmatmul.f32.gmra.mxu1 %v1503_v11  ;;  %1703 = vmatmul.f32.gmra.mxu2 %v1504_v0 }
 0x352   : > { %v1046_v3 = vmax.f32 %v3525_v40, %v3523_v49 }
 0x354   : > { %v3507_v43 = vpop.eup %2127 }
 0x355   : > { %v3511_v22 = vpop.eup %2129 }
 0x356   : > { %v1310_v18 = vadd.f32 %v3511_v22, %v3507_v43 }
 0x357   : > { %v953_v60 = vpop.f32.mrf.mxu0  ;;  %v840_v1 = vpop.f32.mrf.mxu3 }
 0x358   : > { %1044 = vmax.xlane.f32.xlu2 %v1043_v50  ;;  %1311 = vadd.xlane.f32.xlu1 %v1310_v18 }
 0x35f   : > { %v956_v46 = vpop.f32.mrf.mxu0 }
 0x360   : > { %1047 = vmax.xlane.f32.xlu1 %v1046_v3 }
 0x393   : > { %v1291_v41 = vpop.xlane.xlu2 %1290 }
 0x394   : > { %2131 = vrcp.f32 %v1291_v41 }
 0x396   : > { %v1570_v2 = vpop.f32.mrf.mxu1 }
 0x39a   : > { %v2132_v8 = vpop.eup %2131 }
 0x39b   : > { %v1401_v35 = vmul.f32 %v2132_v8, %v1291_v41  ;;  %v1027_v16 = vpop.xlane.xlu2 %1026  ;;  %v1294_v19 = vpop.xlane.xlu1 %1293 }
 0x39c   : > { %v1105_v59 = vsub.f32 %v3379_v48, %v1027_v16  ;;  %v1106_v13 = vsub.f32 %v3373_v55, %v1027_v16  ;;  %2133 = vrcp.f32 %v1294_v19  ;;  %v1683_v30 = vpop.f32.mrf.mxu2 }
 0x39d   : > { %v1433_v32 = vsub.f32 2.0, %v1401_v35  ;;  %v1684_v21 = vadd.f32 %v1683_v30, %v1570_v2  ;;  %v735_v35 = vld [vmem:[%s3875_s3 + $0x180] sm:$0xff] }
 0x39e   : > { %v1201_v15 = vmul.f32 1.442695, %v1105_v59  ;;  %v1203_v12 = vmul.f32 1.442695, %v1106_v13  ;;  %v1573_v61 = vpop.f32.mrf.mxu1 }
 0x39f   : > { %v1465_v6 = vmul.f32 %v2132_v8, %v1433_v32  ;;  %1779 = vst [vmem:[%s3534_s11] sm:$0xff] %v1684_v21 }
 0x3a0   : > { %2135 = vpow2.f32 %v1201_v15 }
 0x3a1   : > { %2137 = vpow2.f32 %v1203_v12  ;;  %v1505_v31 = vmul.f32 %v3359_v10, %v1465_v6  ;;  %v1506_v48 = vmul.f32 %v3361_v56, %v1465_v6  ;;  %v843_v10 = vpop.f32.mrf.mxu3  ;;  %v3562_v12 = vadd.f32 %v840_v1, %v735_v35  ;;  %v738_v1 = vld [vmem:[%s3875_s3 + $0x198] sm:$0xff] }
 0x3a2   : > { %v2134_v23 = vpop.eup %2133 }
 0x3a3   : > { %v1402_v55 = vmul.f32 %v2134_v23, %v1294_v19  ;;  %v1030_v33 = vpop.xlane.xlu1 %1029  ;;  %1593 = vmatmul.f32.gmra.mxu1 %v1505_v31  ;;  %1706 = vmatmul.f32.gmra.mxu2 %v1506_v48  ;;  %v1297_v26 = vpop.xlane.xlu0 %1296 }
 0x3a4   : > { %v1107_v11 = vsub.f32 %v3401_v36, %v1030_v33  ;;  %v1108_v0 = vsub.f32 %v3395_v57, %v1030_v33  ;;  %2139 = vrcp.f32 %v1297_v26  ;;  %v1686_v5 = vpop.f32.mrf.mxu2  ;;  %v736_v57 = vld [vmem:[%s3875_s3 + $0x188] sm:$0xff] }
 0x3a5   : > { %v1434_v50 = vsub.f32 2.0, %v1402_v55  ;;  %v1687_v18 = vadd.f32 %v1686_v5, %v1573_v61  ;;  %v3556_v13 = vadd.f32 %v953_v60, %v736_v57  ;;  %v959_v61 = vpop.f32.mrf.mxu0 }
 0x3a6   : > { %v3541_v29 = vpop.eup %2135  ;;  %v1205_v56 = vmul.f32 1.442695, %v1107_v11  ;;  %v1207_v4 = vmul.f32 1.442695, %v1108_v0  ;;  %v1576_v58 = vpop.f32.mrf.mxu1  ;;  %v737_v0 = vld [vmem:[%s3875_s3 + $0x190] sm:$0xff] }
 0x3a7   : > { %v3543_v20 = vpop.eup %2137  ;;  %v1466_v3 = vmul.f32 %v2134_v23, %v1434_v50  ;;  %1780 = vst [vmem:[%s3534_s11 + $0x8] sm:$0xff] %v1687_v18  ;;  %v3585_v57 = vadd.f32 %v843_v10, %v737_v0  ;;  %v740_v10 = vld [vmem:[%s3875_s3 + $0x1a8] sm:$0xff] }
 0x3a8   : > { %2141 = vpow2.f32 %v1205_v56  ;;  %v1313_v36 = vadd.f32 %v3543_v20, %v3541_v29  ;;  %v3579_v56 = vadd.f32 %v956_v46, %v738_v1 }
 0x3a9   : > { %2143 = vpow2.f32 %v1207_v4  ;;  %v1507_v41 = vmul.f32 %v3377_v9, %v1466_v3  ;;  %v1508_v2 = vmul.f32 %v3381_v54, %v1466_v3  ;;  %v846_v55 = vpop.f32.mrf.mxu3 }
 0x3aa   : > { %v2140_v8 = vpop.eup %2139  ;;  %1314 = vadd.xlane.f32.xlu0 %v1313_v36 }
 0x3ab   : > { %v1403_v16 = vmul.f32 %v2140_v8, %v1297_v26  ;;  %v1300_v19 = vpop.xlane.xlu2 %1299  ;;  %1596 = vmatmul.f32.gmra.mxu1 %v1507_v41  ;;  %1709 = vmatmul.f32.gmra.mxu2 %v1508_v2  ;;  %v1033_v59 = vpop.xlane.xlu0 %1032 }
 0x3ac   : > { %2145 = vrcp.f32 %v1300_v19  ;;  %v1109_v30 = vsub.f32 %v3423_v53, %v1033_v59  ;;  %v1110_v9 = vsub.f32 %v3417_v28, %v1033_v59  ;;  %v1689_v54 = vpop.f32.mrf.mxu2  ;;  %v1049_v28 = vmax.f32 %v3562_v12, %v3556_v13 }
 0x3ad   : > { %v1435_v32 = vsub.f32 2.0, %v1403_v16  ;;  %v1690_v21 = vadd.f32 %v1689_v54, %v1576_v58  ;;  %v962_v46 = vpop.f32.mrf.mxu0  ;;  %v739_v54 = vld [vmem:[%s3875_s3 + $0x1a0] sm:$0xff] }
 0x3ae   : > { %v3560_v15 = vpop.eup %2141  ;;  %v1209_v6 = vmul.f32 1.442695, %v1109_v30  ;;  %v1211_v31 = vmul.f32 1.442695, %v1110_v9  ;;  %v1579_v48 = vpop.f32.mrf.mxu1  ;;  %v3608_v1 = vadd.f32 %v846_v55, %v739_v54 }
 0x3af   : > { %v3564_v23 = vpop.eup %2143  ;;  %v1467_v60 = vmul.f32 %v2140_v8, %v1435_v32  ;;  %1781 = vst [vmem:[%s3534_s11 + $0x10] sm:$0xff] %v1690_v21 }
 0x3b0   : > { %2147 = vpow2.f32 %v1209_v6  ;;  %v1316_v53 = vadd.f32 %v3564_v23, %v3560_v15 }
 0x3b1   : > { %2149 = vpow2.f32 %v1211_v31  ;;  %v1509_v33 = vmul.f32 %v3399_v17, %v1467_v60  ;;  %v1510_v26 = vmul.f32 %v3403_v42, %v1467_v60  ;;  %v849_v9 = vpop.f32.mrf.mxu3  ;;  %v3602_v31 = vadd.f32 %v959_v61, %v740_v10 }
 0x3b2   : > { %v2146_v11 = vpop.eup %2145  ;;  %1050 = vmax.xlane.f32.xlu0 %v1049_v28  ;;  %1317 = vadd.xlane.f32.xlu2 %v1316_v53 }
 0x3b3   : > { %v1404_v5 = vmul.f32 %v2146_v11, %v1300_v19  ;;  %v1036_v50 = vpop.xlane.xlu2 %1035  ;;  %v1303_v18 = vpop.xlane.xlu1 %1302  ;;  %1599 = vmatmul.f32.gmra.mxu1 %v1509_v33  ;;  %1712 = vmatmul.f32.gmra.mxu2 %v1510_v26 }
 0x3b4   : > { %v1111_v4 = vsub.f32 %v3445_v39, %v1036_v50  ;;  %v1112_v17 = vsub.f32 %v3439_v52, %v1036_v50  ;;  %2151 = vrcp.f32 %v1303_v18  ;;  %v1692_v42 = vpop.f32.mrf.mxu2  ;;  %v1052_v52 = vmax.f32 %v3585_v57, %v3579_v56 }
 0x3b5   : > { %v1436_v58 = vsub.f32 2.0, %v1404_v5  ;;  %v1693_v3 = vadd.f32 %v1692_v42, %v1579_v48  ;;  %v742_v5 = vld [vmem:[%s3875_s3 + $0x1b8] sm:$0xff] }
 0x3b6   : > { %v3583_v36 = vpop.eup %2147  ;;  %v1213_v41 = vmul.f32 1.442695, %v1111_v4  ;;  %v1215_v2 = vmul.f32 1.442695, %v1112_v17  ;;  %v1582_v8 = vpop.f32.mrf.mxu1  ;;  %v741_v17 = vld [vmem:[%s3875_s3 + $0x1b0] sm:$0xff] }
 0x3b7   : > { %v3587_v35 = vpop.eup %2149  ;;  %v1468_v16 = vmul.f32 %v2146_v11, %v1436_v58  ;;  %1782 = vst [vmem:[%s3534_s11 + $0x18] sm:$0xff] %v1693_v3  ;;  %v965_v4 = vpop.f32.mrf.mxu0  ;;  %v3631_v10 = vadd.f32 %v849_v9, %v741_v17  ;;  %v746_v17 = vld [vmem:[%s3875_s3 + $0x1d8] sm:$0xff] }
 0x3b8   : > { %2153 = vpow2.f32 %v1213_v41  ;;  %v1319_v39 = vadd.f32 %v3587_v35, %v3583_v36  ;;  %v3625_v41 = vadd.f32 %v962_v46, %v742_v5  ;;  %v744_v46 = vld [vmem:[%s3875_s3 + $0x1c8] sm:$0xff] }
 0x3b9   : > { %2155 = vpow2.f32 %v1215_v2  ;;  %v1511_v19 = vmul.f32 %v3421_v45, %v1468_v16  ;;  %v1512_v59 = vmul.f32 %v3425_v38, %v1468_v16 }
 0x3ba   : > { %v2152_v30 = vpop.eup %2151  ;;  %1053 = vmax.xlane.f32.xlu2 %v1052_v52  ;;  %1320 = vadd.xlane.f32.xlu1 %v1319_v39 }
 0x3bb   : > { %v1405_v32 = vmul.f32 %v2152_v30, %v1303_v18  ;;  %v1039_v21 = vpop.xlane.xlu1 %1038  ;;  %1602 = vmatmul.f32.gmra.mxu1 %v1511_v19  ;;  %1715 = vmatmul.f32.gmra.mxu2 %v1512_v59  ;;  %v1306_v6 = vpop.xlane.xlu0 %1305 }
 0x3bc   : > { %v1113_v45 = vsub.f32 %v3467_v7, %v1039_v21  ;;  %v1114_v38 = vsub.f32 %v3461_v34, %v1039_v21  ;;  %2157 = vrcp.f32 %v1306_v6  ;;  %v1695_v48 = vpop.f32.mrf.mxu2  ;;  %v1055_v34 = vmax.f32 %v3608_v1, %v3602_v31 }
 0x3bd   : > { %v1437_v60 = vsub.f32 2.0, %v1405_v32  ;;  %v1696_v28 = vadd.f32 %v1695_v48, %v1582_v8  ;;  %v852_v8 = vpop.f32.mrf.mxu3 }
 0x3be   : > { %v3606_v53 = vpop.eup %2153  ;;  %v1217_v33 = vmul.f32 1.442695, %v1113_v45  ;;  %v1219_v26 = vmul.f32 1.442695, %v1114_v38  ;;  %v1585_v61 = vpop.f32.mrf.mxu1  ;;  %v743_v45 = vld [vmem:[%s3875_s3 + $0x1c0] sm:$0xff] }
 0x3bf   : > { %v3610_v11 = vpop.eup %2155  ;;  %v1469_v0 = vmul.f32 %v2152_v30, %v1437_v60  ;;  %1783 = vst [vmem:[%s3534_s11 + $0x20] sm:$0xff] %v1696_v28  ;;  %v3648_v28 = vadd.f32 %v965_v4, %v744_v46 }
 0x3c0   : > { %2159 = vpow2.f32 %v1217_v33  ;;  %v1322_v7 = vadd.f32 %v3610_v11, %v3606_v53 }
 0x3c1   : > { %2161 = vpow2.f32 %v1219_v26  ;;  %v1513_v55 = vmul.f32 %v3443_v24, %v1469_v0  ;;  %v1514_v50 = vmul.f32 %v3447_v63, %v1469_v0  ;;  %v968_v26 = vpop.f32.mrf.mxu0 }
 0x3c2   : > { %v2158_v18 = vpop.eup %2157  ;;  %1323 = vadd.xlane.f32.xlu0 %v1322_v7  ;;  %1056 = vmax.xlane.f32.xlu1 %v1055_v34  ;;  %v3654_v34 = vadd.f32 %v852_v8, %v743_v45  ;;  %v3671_v8 = vadd.f32 %v968_v26, %v746_v17  ;;  %v748_v45 = vld [vmem:[%s3875_s3 + $0x1e8] sm:$0xff] }
 0x3c3   : > { %v1406_v42 = vmul.f32 %v2158_v18, %v1306_v6  ;;  %v1309_v58 = vpop.xlane.xlu2 %1308  ;;  %1605 = vmatmul.f32.gmra.mxu1 %v1513_v55  ;;  %1718 = vmatmul.f32.gmra.mxu2 %v1514_v50  ;;  %v1042_v3 = vpop.xlane.xlu0 %1041 }
 0x3c4   : > { %2163 = vrcp.f32 %v1309_v58  ;;  %v1115_v24 = vsub.f32 %v3489_v44, %v1042_v3  ;;  %v1116_v63 = vsub.f32 %v3483_v47, %v1042_v3  ;;  %v1698_v2 = vpop.f32.mrf.mxu2  ;;  %v1058_v44 = vmax.f32 %v3631_v10, %v3625_v41 }
 0x3c5   : > { %v1438_v16 = vsub.f32 2.0, %v1406_v42  ;;  %v1699_v52 = vadd.f32 %v1698_v2, %v1585_v61 }
 0x3c6   : > { %v3629_v39 = vpop.eup %2159  ;;  %v1221_v19 = vmul.f32 1.442695, %v1115_v24  ;;  %v1223_v59 = vmul.f32 1.442695, %v1116_v63  ;;  %v1588_v6 = vpop.f32.mrf.mxu1  ;;  %v745_v24 = vld [vmem:[%s3875_s3 + $0x1d0] sm:$0xff] }
 0x3c7   : > { %v3633_v30 = vpop.eup %2161  ;;  %v1470_v54 = vmul.f32 %v2158_v18, %v1438_v16  ;;  %1784 = vst [vmem:[%s3534_s11 + $0x28] sm:$0xff] %v1699_v52  ;;  %v855_v18 = vpop.f32.mrf.mxu3 }
 0x3c8   : > { %2165 = vpow2.f32 %v1221_v19  ;;  %v1325_v47 = vadd.f32 %v3633_v30, %v3629_v39 }
 0x3c9   : > { %2167 = vpow2.f32 %v1223_v59  ;;  %v1515_v9 = vmul.f32 %v3465_v27, %v1470_v54  ;;  %v1516_v32 = vmul.f32 %v3469_v62, %v1470_v54 }
 0x3ca   : > { %v2164_v21 = vpop.eup %2163  ;;  %1059 = vmax.xlane.f32.xlu0 %v1058_v44  ;;  %1326 = vadd.xlane.f32.xlu2 %v1325_v47  ;;  %v3677_v44 = vadd.f32 %v855_v18, %v745_v24 }
 0x3cb   : > { %v1407_v38 = vmul.f32 %v2164_v21, %v1309_v58  ;;  %v1045_v48 = vpop.xlane.xlu2 %1044  ;;  %v1312_v60 = vpop.xlane.xlu1 %1311  ;;  %1608 = vmatmul.f32.gmra.mxu1 %v1515_v9  ;;  %1721 = vmatmul.f32.gmra.mxu2 %v1516_v32 }
 0x3cc   : > { %v1117_v27 = vsub.f32 %v3509_v51, %v1045_v48  ;;  %v1118_v62 = vsub.f32 %v3505_v25, %v1045_v48  ;;  %2169 = vrcp.f32 %v1312_v60  ;;  %v1701_v33 = vpop.f32.mrf.mxu2  ;;  %v1061_v25 = vmax.f32 %v3654_v34, %v3648_v28  ;;  %v971_v32 = vpop.f32.mrf.mxu0 }
 0x3cd   : > { %v1439_v0 = vsub.f32 2.0, %v1407_v38  ;;  %v1702_v61 = vadd.f32 %v1701_v33, %v1588_v6 }
 0x3ce   : > { %v3652_v7 = vpop.eup %2165  ;;  %v1225_v5 = vmul.f32 1.442695, %v1117_v27  ;;  %v1227_v55 = vmul.f32 1.442695, %v1118_v62  ;;  %v1591_v16 = vpop.f32.mrf.mxu1  ;;  %v3694_v27 = vadd.f32 %v971_v32, %v748_v45 }
 0x3cf   : > { %v3656_v50 = vpop.eup %2167  ;;  %v1471_v4 = vmul.f32 %v2164_v21, %v1439_v0  ;;  %1785 = vst [vmem:[%s3534_s11 + $0x30] sm:$0xff] %v1702_v61  ;;  %v858_v6 = vpop.f32.mrf.mxu3  ;;  %v750_v0 = vld [vmem:[%s3875_s3 + $0x1f8] sm:$0xff] }
 0x3d0   : > { %2171 = vpow2.f32 %v1225_v5  ;;  %v1328_v51 = vadd.f32 %v3656_v50, %v3652_v7  ;;  %v749_v5 = vld [vmem:[%s3875_s3 + $0x1f0] sm:$0xff] }
 0x3d1   : > { %2173 = vpow2.f32 %v1227_v55  ;;  %v1517_v42 = vmul.f32 %v3487_v37, %v1471_v4  ;;  %v1518_v58 = vmul.f32 %v3491_v14, %v1471_v4 }
 0x3d2   : > { %v2170_v3 = vpop.eup %2169  ;;  %1062 = vmax.xlane.f32.xlu2 %v1061_v25  ;;  %1329 = vadd.xlane.f32.xlu1 %v1328_v51 }
 0x3d3   : > { %v1408_v63 = vmul.f32 %v2170_v3, %v1312_v60  ;;  %v1048_v2 = vpop.xlane.xlu1 %1047  ;;  %1611 = vmatmul.f32.gmra.mxu1 %v1517_v42  ;;  %1724 = vmatmul.f32.gmra.mxu2 %v1518_v58  ;;  %v747_v60 = vld [vmem:[%s3875_s3 + $0x1e0] sm:$0xff] }
 0x3d4   : > { %v1119_v52 = vsub.f32 %v3525_v40, %v1048_v2  ;;  %v1120_v37 = vsub.f32 %v3523_v49, %v1048_v2  ;;  %v1704_v14 = vpop.f32.mrf.mxu2  ;;  %v1064_v49 = vmax.f32 %v3677_v44, %v3671_v8  ;;  %v3698_v33 = vadd.f32 %v858_v6, %v747_v60  ;;  %v974_v61 = vpop.f32.mrf.mxu0 }
 0x3d5   : > { %v1440_v19 = vsub.f32 2.0, %v1408_v63  ;;  %v1705_v59 = vadd.f32 %v1704_v14, %v1591_v16  ;;  %v3712_v18 = vadd.f32 %v974_v61, %v750_v0 }
 0x3d6   : > { %v3675_v54 = vpop.eup %2171  ;;  %v1229_v47 = vmul.f32 1.442695, %v1119_v52  ;;  %v1231_v46 = vmul.f32 1.442695, %v1120_v37 }
 0x3d7   : > { %v3679_v9 = vpop.eup %2173  ;;  %v1472_v21 = vmul.f32 %v2170_v3, %v1440_v19  ;;  %1786 = vst [vmem:[%s3534_s11 + $0x38] sm:$0xff] %v1705_v59  ;;  %v861_v55 = vpop.f32.mrf.mxu3 }
 0x3d8   : > { %2175 = vpow2.f32 %v1229_v47  ;;  %v1331_v40 = vadd.f32 %v3679_v9, %v3675_v54  ;;  %v3714_v4 = vadd.f32 %v861_v55, %v749_v5 }
 0x3d9   : > { %2177 = vpow2.f32 %v1231_v46  ;;  %v1519_v38 = vmul.f32 %v3507_v43, %v1472_v21  ;;  %v1520_v48 = vmul.f32 %v3511_v22, %v1472_v21  ;;  %v1067_v43 = vmax.f32 %v3698_v33, %v3694_v27 }
 0x3da   : > { %1332 = vadd.xlane.f32.xlu0 %v1331_v40  ;;  %1065 = vmax.xlane.f32.xlu1 %v1064_v49  ;;  %v1070_v25 = vmax.f32 %v3714_v4, %v3712_v18 }
 0x3db   : > { %1614 = vmatmul.f32.gmra.mxu1 %v1519_v38  ;;  %1727 = vmatmul.f32.gmra.mxu2 %v1520_v48 }
 0x3de   : > { %v3696_v62 = vpop.eup %2175 }
 0x3df   : > { %v3700_v26 = vpop.eup %2177 }
 0x3e0   : > { %v1334_v22 = vadd.f32 %v3700_v26, %v3696_v62 }
 0x3e2   : > { %1068 = vmax.xlane.f32.xlu0 %v1067_v43  ;;  %1335 = vadd.xlane.f32.xlu2 %v1334_v22 }
 0x3ea   : > { %1071 = vmax.xlane.f32.xlu2 %v1070_v25 }
 0x41d   : > { %v1315_v51 = vpop.xlane.xlu0 %1314 }
 0x41e   : > { %2179 = vrcp.f32 %v1315_v51 }
 0x420   : > { %v1594_v17 = vpop.f32.mrf.mxu1 }
 0x424   : > { %v2180_v42 = vpop.eup %2179 }
 0x425   : > { %v1409_v58 = vmul.f32 %v2180_v42, %v1315_v51  ;;  %v1318_v3 = vpop.xlane.xlu2 %1317  ;;  %v1051_v24 = vpop.xlane.xlu0 %1050 }
 0x426   : > { %2181 = vrcp.f32 %v1318_v3  ;;  %v1121_v63 = vsub.f32 %v3562_v12, %v1051_v24  ;;  %v1122_v2 = vsub.f32 %v3556_v13, %v1051_v24  ;;  %v1707_v16 = vpop.f32.mrf.mxu2 }
 0x427   : > { %v1441_v52 = vsub.f32 2.0, %v1409_v58  ;;  %v1708_v37 = vadd.f32 %v1707_v16, %v1594_v17 }
 0x428   : > { %v1233_v14 = vmul.f32 1.442695, %v1121_v63  ;;  %v1235_v19 = vmul.f32 1.442695, %v1122_v2  ;;  %v1597_v59 = vpop.f32.mrf.mxu1 }
 0x429   : > { %v1473_v47 = vmul.f32 %v2180_v42, %v1441_v52  ;;  %1787 = vst [vmem:[%s3534_s11 + $0x40] sm:$0xff] %v1708_v37 }
 0x42a   : > { %2183 = vpow2.f32 %v1233_v14 }
 0x42b   : > { %2185 = vpow2.f32 %v1235_v19  ;;  %v1521_v46 = vmul.f32 %v3541_v29, %v1473_v47  ;;  %v1522_v32 = vmul.f32 %v3543_v20, %v1473_v47 }
 0x42c   : > { %v2182_v21 = vpop.eup %2181 }
 0x42d   : > { %v1410_v40 = vmul.f32 %v2182_v21, %v1318_v3  ;;  %v1054_v49 = vpop.xlane.xlu2 %1053  ;;  %v1321_v12 = vpop.xlane.xlu1 %1320  ;;  %1617 = vmatmul.f32.gmra.mxu1 %v1521_v46  ;;  %1730 = vmatmul.f32.gmra.mxu2 %v1522_v32 }
 0x42e   : > { %v1123_v13 = vsub.f32 %v3585_v57, %v1054_v49  ;;  %v1124_v6 = vsub.f32 %v3579_v56, %v1054_v49  ;;  %2187 = vrcp.f32 %v1321_v12  ;;  %v1710_v45 = vpop.f32.mrf.mxu2 }
 0x42f   : > { %v1442_v38 = vsub.f32 2.0, %v1410_v40  ;;  %v1711_v48 = vadd.f32 %v1710_v45, %v1597_v59 }
 0x430   : > { %v3725_v60 = vpop.eup %2183  ;;  %v1237_v29 = vmul.f32 1.442695, %v1123_v13  ;;  %v1239_v43 = vmul.f32 1.442695, %v1124_v6  ;;  %v1600_v20 = vpop.f32.mrf.mxu1 }
 0x431   : > { %v3727_v22 = vpop.eup %2185  ;;  %v1474_v0 = vmul.f32 %v2182_v21, %v1442_v38  ;;  %1788 = vst [vmem:[%s3534_s11 + $0x48] sm:$0xff] %v1711_v48 }
 0x432   : > { %2189 = vpow2.f32 %v1237_v29  ;;  %v1337_v61 = vadd.f32 %v3727_v22, %v3725_v60 }
 0x433   : > { %2191 = vpow2.f32 %v1239_v43  ;;  %v1523_v56 = vmul.f32 %v3560_v15, %v1474_v0  ;;  %v1524_v57 = vmul.f32 %v3564_v23, %v1474_v0 }
 0x434   : > { %v2188_v5 = vpop.eup %2187  ;;  %1338 = vadd.xlane.f32.xlu1 %v1337_v61 }
 0x435   : > { %v1411_v55 = vmul.f32 %v2188_v5, %v1321_v12  ;;  %v1057_v25 = vpop.xlane.xlu1 %1056  ;;  %1620 = vmatmul.f32.gmra.mxu1 %v1523_v56  ;;  %1733 = vmatmul.f32.gmra.mxu2 %v1524_v57  ;;  %v1324_v51 = vpop.xlane.xlu0 %1323 }
 0x436   : > { %v1125_v17 = vsub.f32 %v3608_v1, %v1057_v25  ;;  %v1126_v42 = vsub.f32 %v3602_v31, %v1057_v25  ;;  %2193 = vrcp.f32 %v1324_v51  ;;  %v1713_v58 = vpop.f32.mrf.mxu2 }
 0x437   : > { %v1443_v3 = vsub.f32 2.0, %v1411_v55  ;;  %v1714_v24 = vadd.f32 %v1713_v58, %v1600_v20 }
 0x438   : > { %v3736_v63 = vpop.eup %2189  ;;  %v1241_v15 = vmul.f32 1.442695, %v1125_v17  ;;  %v1243_v23 = vmul.f32 1.442695, %v1126_v42  ;;  %v1603_v2 = vpop.f32.mrf.mxu1 }
 0x439   : > { %v3738_v16 = vpop.eup %2191  ;;  %v1475_v52 = vmul.f32 %v2188_v5, %v1443_v3  ;;  %1789 = vst [vmem:[%s3534_s11 + $0x50] sm:$0xff] %v1714_v24 }
 0x43a   : > { %2195 = vpow2.f32 %v1241_v15  ;;  %v1340_v37 = vadd.f32 %v3738_v16, %v3736_v63 }
 0x43b   : > { %2197 = vpow2.f32 %v1243_v23  ;;  %v1525_v31 = vmul.f32 %v3583_v36, %v1475_v52  ;;  %v1526_v1 = vmul.f32 %v3587_v35, %v1475_v52 }
 0x43c   : > { %v2194_v14 = vpop.eup %2193  ;;  %1341 = vadd.xlane.f32.xlu0 %v1340_v37 }
 0x43d   : > { %v1412_v19 = vmul.f32 %v2194_v14, %v1324_v51  ;;  %v1327_v59 = vpop.xlane.xlu2 %1326  ;;  %1623 = vmatmul.f32.gmra.mxu1 %v1525_v31  ;;  %1736 = vmatmul.f32.gmra.mxu2 %v1526_v1  ;;  %v1060_v47 = vpop.xlane.xlu0 %1059 }
 0x43e   : > { %2199 = vrcp.f32 %v1327_v59  ;;  %v1127_v46 = vsub.f32 %v3631_v10, %v1060_v47  ;;  %v1128_v32 = vsub.f32 %v3625_v41, %v1060_v47  ;;  %v1716_v21 = vpop.f32.mrf.mxu2 }
 0x43f   : > { %v1444_v40 = vsub.f32 2.0, %v1412_v19  ;;  %v1717_v49 = vadd.f32 %v1716_v21, %v1603_v2 }
 0x440   : > { %v3747_v12 = vpop.eup %2195  ;;  %v1245_v36 = vmul.f32 1.442695, %v1127_v46  ;;  %v1247_v35 = vmul.f32 1.442695, %v1128_v32  ;;  %v1606_v13 = vpop.f32.mrf.mxu1 }
 0x441   : > { %v3749_v6 = vpop.eup %2197  ;;  %v1476_v45 = vmul.f32 %v2194_v14, %v1444_v40  ;;  %1790 = vst [vmem:[%s3534_s11 + $0x58] sm:$0xff] %v1717_v49 }
 0x442   : > { %2201 = vpow2.f32 %v1245_v36  ;;  %v1343_v38 = vadd.f32 %v3749_v6, %v3747_v12 }
 0x443   : > { %2203 = vpow2.f32 %v1247_v35  ;;  %v1527_v10 = vmul.f32 %v3606_v53, %v1476_v45  ;;  %v1528_v41 = vmul.f32 %v3610_v11, %v1476_v45 }
 0x444   : > { %v2200_v48 = vpop.eup %2199  ;;  %1344 = vadd.xlane.f32.xlu1 %v1343_v38 }
 0x445   : > { %v1413_v29 = vmul.f32 %v2200_v48, %v1327_v59  ;;  %v1063_v43 = vpop.xlane.xlu2 %1062  ;;  %v1330_v20 = vpop.xlane.xlu1 %1329  ;;  %1626 = vmatmul.f32.gmra.mxu1 %v1527_v10  ;;  %1739 = vmatmul.f32.gmra.mxu2 %v1528_v41 }
 0x446   : > { %v1129_v0 = vsub.f32 %v3654_v34, %v1063_v43  ;;  %v1130_v61 = vsub.f32 %v3648_v28, %v1063_v43  ;;  %2205 = vrcp.f32 %v1330_v20  ;;  %v1719_v56 = vpop.f32.mrf.mxu2 }
 0x447   : > { %v1445_v57 = vsub.f32 2.0, %v1413_v29  ;;  %v1720_v5 = vadd.f32 %v1719_v56, %v1606_v13 }
 0x448   : > { %v3758_v55 = vpop.eup %2201  ;;  %v1249_v53 = vmul.f32 1.442695, %v1129_v0  ;;  %v1251_v11 = vmul.f32 1.442695, %v1130_v61  ;;  %v1609_v17 = vpop.f32.mrf.mxu1 }
 0x449   : > { %v3760_v25 = vpop.eup %2203  ;;  %v1477_v51 = vmul.f32 %v2200_v48, %v1445_v57  ;;  %1791 = vst [vmem:[%s3534_s11 + $0x60] sm:$0xff] %v1720_v5 }
 0x44a   : > { %2207 = vpow2.f32 %v1249_v53  ;;  %v1346_v42 = vadd.f32 %v3760_v25, %v3758_v55 }
 0x44b   : > { %2209 = vpow2.f32 %v1251_v11  ;;  %v1529_v28 = vmul.f32 %v3629_v39, %v1477_v51  ;;  %v1530_v34 = vmul.f32 %v3633_v30, %v1477_v51 }
 0x44c   : > { %v2206_v58 = vpop.eup %2205  ;;  %1347 = vadd.xlane.f32.xlu2 %v1346_v42 }
 0x44d   : > { %v1414_v3 = vmul.f32 %v2206_v58, %v1330_v20  ;;  %v1066_v24 = vpop.xlane.xlu1 %1065  ;;  %1629 = vmatmul.f32.gmra.mxu1 %v1529_v28  ;;  %1742 = vmatmul.f32.gmra.mxu2 %v1530_v34  ;;  %v1333_v15 = vpop.xlane.xlu0 %1332 }
 0x44e   : > { %v1131_v23 = vsub.f32 %v3677_v44, %v1066_v24  ;;  %v1132_v2 = vsub.f32 %v3671_v8, %v1066_v24  ;;  %2211 = vrcp.f32 %v1333_v15  ;;  %v1722_v52 = vpop.f32.mrf.mxu2 }
 0x44f   : > { %v1446_v37 = vsub.f32 2.0, %v1414_v3  ;;  %v1723_v31 = vadd.f32 %v1722_v52, %v1609_v17 }
 0x450   : > { %v3769_v1 = vpop.eup %2207  ;;  %v1253_v39 = vmul.f32 1.442695, %v1131_v23  ;;  %v1255_v30 = vmul.f32 1.442695, %v1132_v2  ;;  %v1612_v46 = vpop.f32.mrf.mxu1 }
 0x451   : > { %v3771_v14 = vpop.eup %2209  ;;  %v1478_v19 = vmul.f32 %v2206_v58, %v1446_v37  ;;  %1792 = vst [vmem:[%s3534_s11 + $0x68] sm:$0xff] %v1723_v31 }
 0x452   : > { %2213 = vpow2.f32 %v1253_v39  ;;  %v1349_v59 = vadd.f32 %v3771_v14, %v3769_v1 }
 0x453   : > { %2215 = vpow2.f32 %v1255_v30  ;;  %v1531_v44 = vmul.f32 %v3652_v7, %v1478_v19  ;;  %v1532_v8 = vmul.f32 %v3656_v50, %v1478_v19 }
 0x454   : > { %v2212_v47 = vpop.eup %2211  ;;  %1350 = vadd.xlane.f32.xlu0 %v1349_v59 }
 0x455   : > { %v1415_v32 = vmul.f32 %v2212_v47, %v1333_v15  ;;  %v1336_v21 = vpop.xlane.xlu2 %1335  ;;  %1632 = vmatmul.f32.gmra.mxu1 %v1531_v44  ;;  %1745 = vmatmul.f32.gmra.mxu2 %v1532_v8  ;;  %v1069_v40 = vpop.xlane.xlu0 %1068 }
 0x456   : > { %2217 = vrcp.f32 %v1336_v21  ;;  %v1133_v49 = vsub.f32 %v3698_v33, %v1069_v40  ;;  %v1134_v36 = vsub.f32 %v3694_v27, %v1069_v40  ;;  %v1725_v35 = vpop.f32.mrf.mxu2 }
 0x457   : > { %v1447_v13 = vsub.f32 2.0, %v1415_v32  ;;  %v1726_v45 = vadd.f32 %v1725_v35, %v1612_v46 }
 0x458   : > { %v3780_v7 = vpop.eup %2213  ;;  %v1257_v50 = vmul.f32 1.442695, %v1133_v49  ;;  %v1259_v38 = vmul.f32 1.442695, %v1134_v36  ;;  %v1615_v0 = vpop.f32.mrf.mxu1 }
 0x459   : > { %v3782_v10 = vpop.eup %2215  ;;  %v1479_v41 = vmul.f32 %v2212_v47, %v1447_v13  ;;  %1793 = vst [vmem:[%s3534_s11 + $0x70] sm:$0xff] %v1726_v45 }
 0x45a   : > { %2219 = vpow2.f32 %v1257_v50  ;;  %v1352_v48 = vadd.f32 %v3782_v10, %v3780_v7 }
 0x45b   : > { %2221 = vpow2.f32 %v1259_v38  ;;  %v1533_v33 = vmul.f32 %v3675_v54, %v1479_v41  ;;  %v1534_v27 = vmul.f32 %v3679_v9, %v1479_v41 }
 0x45c   : > { %v2218_v29 = vpop.eup %2217  ;;  %1353 = vadd.xlane.f32.xlu1 %v1352_v48 }
 0x45d   : > { %v1416_v43 = vmul.f32 %v2218_v29, %v1336_v21  ;;  %v1072_v20 = vpop.xlane.xlu2 %1071  ;;  %1635 = vmatmul.f32.gmra.mxu1 %v1533_v33  ;;  %1748 = vmatmul.f32.gmra.mxu2 %v1534_v27 }
 0x45e   : > { %v1135_v61 = vsub.f32 %v3714_v4, %v1072_v20  ;;  %v1136_v56 = vsub.f32 %v3712_v18, %v1072_v20  ;;  %v1728_v57 = vpop.f32.mrf.mxu2 }
 0x45f   : > { %v1448_v5 = vsub.f32 2.0, %v1416_v43  ;;  %v1729_v53 = vadd.f32 %v1728_v57, %v1615_v0 }
 0x460   : > { %v3791_v11 = vpop.eup %2219  ;;  %v1261_v54 = vmul.f32 1.442695, %v1135_v61  ;;  %v1263_v51 = vmul.f32 1.442695, %v1136_v56 }
 0x461   : > { %v3793_v9 = vpop.eup %2221  ;;  %v1480_v17 = vmul.f32 %v2218_v29, %v1448_v5  ;;  %1794 = vst [vmem:[%s3534_s11 + $0x78] sm:$0xff] %v1729_v53 }
 0x462   : > { %2223 = vpow2.f32 %v1261_v54  ;;  %v1355_v42 = vadd.f32 %v3793_v9, %v3791_v11 }
 0x463   : > { %2225 = vpow2.f32 %v1263_v51  ;;  %v1535_v4 = vmul.f32 %v3696_v62, %v1480_v17  ;;  %v1536_v18 = vmul.f32 %v3700_v26, %v1480_v17 }
 0x464   : > { %1356 = vadd.xlane.f32.xlu2 %v1355_v42 }
 0x465   : > { %1638 = vmatmul.f32.gmra.mxu1 %v1535_v4  ;;  %1751 = vmatmul.f32.gmra.mxu2 %v1536_v18 }
 0x468   : > { %v3800_v28 = vpop.eup %2223 }
 0x469   : > { %v3802_v34 = vpop.eup %2225 }
 0x46a   : > { %v1358_v58 = vadd.f32 %v3802_v34, %v3800_v28 }
 0x46c   : > { %1359 = vadd.xlane.f32.xlu0 %v1358_v58 }
 0x4a7   : > { %v1339_v3 = vpop.xlane.xlu1 %1338 }
 0x4a8   : > { %2227 = vrcp.f32 %v1339_v3 }
 0x4aa   : > { %v1618_v24 = vpop.f32.mrf.mxu1 }
 0x4ae   : > { %v2228_v15 = vpop.eup %2227 }
 0x4af   : > { %v1417_v23 = vmul.f32 %v2228_v15, %v1339_v3  ;;  %v1342_v62 = vpop.xlane.xlu0 %1341 }
 0x4b0   : > { %2229 = vrcp.f32 %v1342_v62  ;;  %v1731_v26 = vpop.f32.mrf.mxu2 }
 0x4b1   : > { %v1449_v2 = vsub.f32 2.0, %v1417_v23  ;;  %v1732_v52 = vadd.f32 %v1731_v26, %v1618_v24 }
 0x4b2   : > { %v1621_v37 = vpop.f32.mrf.mxu1 }
 0x4b3   : > { %v1481_v31 = vmul.f32 %v2228_v15, %v1449_v2  ;;  %1795 = vst [vmem:[%s3534_s11 + $0x80] sm:$0xff] %v1732_v52 }
 0x4b5   : > { %v1537_v39 = vmul.f32 %v3725_v60, %v1481_v31  ;;  %v1538_v30 = vmul.f32 %v3727_v22, %v1481_v31 }
 0x4b6   : > { %v2230_v19 = vpop.eup %2229 }
 0x4b7   : > { %v1418_v59 = vmul.f32 %v2230_v19, %v1342_v62  ;;  %v1345_v44 = vpop.xlane.xlu1 %1344  ;;  %1641 = vmatmul.f32.gmra.mxu1 %v1537_v39  ;;  %1754 = vmatmul.f32.gmra.mxu2 %v1538_v30 }
 0x4b8   : > { %2231 = vrcp.f32 %v1345_v44  ;;  %v1734_v8 = vpop.f32.mrf.mxu2 }
 0x4b9   : > { %v1450_v47 = vsub.f32 2.0, %v1418_v59  ;;  %v1735_v46 = vadd.f32 %v1734_v8, %v1621_v37 }
 0x4ba   : > { %v1624_v32 = vpop.f32.mrf.mxu1 }
 0x4bb   : > { %v1482_v21 = vmul.f32 %v2230_v19, %v1450_v47  ;;  %1796 = vst [vmem:[%s3534_s11 + $0x88] sm:$0xff] %v1735_v46 }
 0x4bd   : > { %v1539_v40 = vmul.f32 %v3736_v63, %v1482_v21  ;;  %v1540_v49 = vmul.f32 %v3738_v16, %v1482_v21 }
 0x4be   : > { %v2232_v60 = vpop.eup %2231 }
 0x4bf   : > { %v1419_v36 = vmul.f32 %v2232_v60, %v1345_v44  ;;  %v1348_v22 = vpop.xlane.xlu2 %1347  ;;  %1644 = vmatmul.f32.gmra.mxu1 %v1539_v40  ;;  %1757 = vmatmul.f32.gmra.mxu2 %v1540_v49 }
 0x4c0   : > { %2233 = vrcp.f32 %v1348_v22  ;;  %v1737_v35 = vpop.f32.mrf.mxu2 }
 0x4c1   : > { %v1451_v13 = vsub.f32 2.0, %v1419_v36  ;;  %v1738_v45 = vadd.f32 %v1737_v35, %v1624_v32 }
 0x4c2   : > { %v1627_v50 = vpop.f32.mrf.mxu1 }
 0x4c3   : > { %v1483_v38 = vmul.f32 %v2232_v60, %v1451_v13  ;;  %1797 = vst [vmem:[%s3534_s11 + $0x90] sm:$0xff] %v1738_v45 }
 0x4c5   : > { %v1541_v41 = vmul.f32 %v3747_v12, %v1483_v38  ;;  %v1542_v48 = vmul.f32 %v3749_v6, %v1483_v38 }
 0x4c6   : > { %v2234_v63 = vpop.eup %2233 }
 0x4c7   : > { %v1420_v33 = vmul.f32 %v2234_v63, %v1348_v22  ;;  %1647 = vmatmul.f32.gmra.mxu1 %v1541_v41  ;;  %1760 = vmatmul.f32.gmra.mxu2 %v1542_v48  ;;  %v1351_v16 = vpop.xlane.xlu0 %1350 }
 0x4c8   : > { %2235 = vrcp.f32 %v1351_v16  ;;  %v1740_v27 = vpop.f32.mrf.mxu2 }
 0x4c9   : > { %v1452_v29 = vsub.f32 2.0, %v1420_v33  ;;  %v1741_v43 = vadd.f32 %v1740_v27, %v1627_v50 }
 0x4ca   : > { %v1630_v20 = vpop.f32.mrf.mxu1 }
 0x4cb   : > { %v1484_v0 = vmul.f32 %v2234_v63, %v1452_v29  ;;  %1798 = vst [vmem:[%s3534_s11 + $0x98] sm:$0xff] %v1741_v43 }
 0x4cd   : > { %v1543_v61 = vmul.f32 %v3758_v55, %v1484_v0  ;;  %v1544_v56 = vmul.f32 %v3760_v25, %v1484_v0 }
 0x4ce   : > { %v2236_v12 = vpop.eup %2235 }
 0x4cf   : > { %v1421_v57 = vmul.f32 %v2236_v12, %v1351_v16  ;;  %v1354_v6 = vpop.xlane.xlu1 %1353  ;;  %1650 = vmatmul.f32.gmra.mxu1 %v1543_v61  ;;  %1763 = vmatmul.f32.gmra.mxu2 %v1544_v56 }
 0x4d0   : > { %2237 = vrcp.f32 %v1354_v6  ;;  %v1743_v5 = vpop.f32.mrf.mxu2 }
 0x4d1   : > { %v1453_v53 = vsub.f32 2.0, %v1421_v57  ;;  %v1744_v54 = vadd.f32 %v1743_v5, %v1630_v20 }
 0x4d2   : > { %v1633_v17 = vpop.f32.mrf.mxu1 }
 0x4d3   : > { %v1485_v51 = vmul.f32 %v2236_v12, %v1453_v53  ;;  %1799 = vst [vmem:[%s3534_s11 + $0xa0] sm:$0xff] %v1744_v54 }
 0x4d5   : > { %v1545_v42 = vmul.f32 %v3769_v1, %v1485_v51  ;;  %v1546_v4 = vmul.f32 %v3771_v14, %v1485_v51 }
 0x4d6   : > { %v2238_v55 = vpop.eup %2237 }
 0x4d7   : > { %v1422_v18 = vmul.f32 %v2238_v55, %v1354_v6  ;;  %v1357_v25 = vpop.xlane.xlu2 %1356  ;;  %1653 = vmatmul.f32.gmra.mxu1 %v1545_v42  ;;  %1766 = vmatmul.f32.gmra.mxu2 %v1546_v4 }
 0x4d8   : > { %2239 = vrcp.f32 %v1357_v25  ;;  %v1746_v58 = vpop.f32.mrf.mxu2 }
 0x4d9   : > { %v1454_v3 = vsub.f32 2.0, %v1422_v18  ;;  %v1747_v24 = vadd.f32 %v1746_v58, %v1633_v17 }
 0x4da   : > { %v1636_v1 = vpop.f32.mrf.mxu1 }
 0x4db   : > { %v1486_v15 = vmul.f32 %v2238_v55, %v1454_v3  ;;  %1800 = vst [vmem:[%s3534_s11 + $0xa8] sm:$0xff] %v1747_v24 }
 0x4dd   : > { %v1547_v23 = vmul.f32 %v3780_v7, %v1486_v15  ;;  %v1548_v62 = vmul.f32 %v3782_v10, %v1486_v15 }
 0x4de   : > { %v2240_v26 = vpop.eup %2239 }
 0x4df   : > { %v1423_v2 = vmul.f32 %v2240_v26, %v1357_v25  ;;  %1656 = vmatmul.f32.gmra.mxu1 %v1547_v23  ;;  %1769 = vmatmul.f32.gmra.mxu2 %v1548_v62  ;;  %v1360_v14 = vpop.xlane.xlu0 %1359 }
 0x4e0   : > { %2241 = vrcp.f32 %v1360_v14  ;;  %v1749_v52 = vpop.f32.mrf.mxu2 }
 0x4e1   : > { %v1455_v37 = vsub.f32 2.0, %v1423_v2  ;;  %v1750_v31 = vadd.f32 %v1749_v52, %v1636_v1 }
 0x4e2   : > { %v1639_v10 = vpop.f32.mrf.mxu1 }
 0x4e3   : > { %v1487_v39 = vmul.f32 %v2240_v26, %v1455_v37  ;;  %1801 = vst [vmem:[%s3534_s11 + $0xb0] sm:$0xff] %v1750_v31 }
 0x4e5   : > { %v1549_v30 = vmul.f32 %v3791_v11, %v1487_v39  ;;  %v1550_v19 = vmul.f32 %v3793_v9, %v1487_v39 }
 0x4e6   : > { %v2242_v7 = vpop.eup %2241 }
 0x4e7   : > { %v1424_v59 = vmul.f32 %v2242_v7, %v1360_v14  ;;  %1659 = vmatmul.f32.gmra.mxu1 %v1549_v30  ;;  %1772 = vmatmul.f32.gmra.mxu2 %v1550_v19 }
 0x4e8   : > { %v1752_v44 = vpop.f32.mrf.mxu2 }
 0x4e9   : > { %v1456_v8 = vsub.f32 2.0, %v1424_v59  ;;  %v1753_v47 = vadd.f32 %v1752_v44, %v1639_v10 }
 0x4eb   : > { %v1488_v46 = vmul.f32 %v2242_v7, %v1456_v8  ;;  %1802 = vst [vmem:[%s3534_s11 + $0xb8] sm:$0xff] %v1753_v47 }
 0x4ed   : > { %v1551_v32 = vmul.f32 %v3800_v28, %v1488_v46  ;;  %v1552_v21 = vmul.f32 %v3802_v34, %v1488_v46 }
 0x4ef   : > { %1662 = vmatmul.f32.gmra.mxu1 %v1551_v32  ;;  %1775 = vmatmul.f32.gmra.mxu2 %v1552_v21 }
 0x534   : > { %v1642_v11 = vpop.f32.mrf.mxu1 }
 0x53a   : > { %v1755_v9 = vpop.f32.mrf.mxu2 }
 0x53b   : > { %v1756_v40 = vadd.f32 %v1755_v9, %v1642_v11 }
 0x53c   : > { %v1645_v49 = vpop.f32.mrf.mxu1 }
 0x53d   : > { %1803 = vst [vmem:[%s3534_s11 + $0xc0] sm:$0xff] %v1756_v40 }
 0x542   : > { %v1758_v60 = vpop.f32.mrf.mxu2 }
 0x543   : > { %v1759_v36 = vadd.f32 %v1758_v60, %v1645_v49 }
 0x544   : > { %v1648_v22 = vpop.f32.mrf.mxu1 }
 0x545   : > { %1804 = vst [vmem:[%s3534_s11 + $0xc8] sm:$0xff] %v1759_v36 }
 0x54a   : > { %v1761_v35 = vpop.f32.mrf.mxu2 }
 0x54b   : > { %v1762_v28 = vadd.f32 %v1761_v35, %v1648_v22 }
 0x54c   : > { %v1651_v13 = vpop.f32.mrf.mxu1 }
 0x54d   : > { %1805 = vst [vmem:[%s3534_s11 + $0xd0] sm:$0xff] %v1762_v28 }
 0x552   : > { %v1764_v34 = vpop.f32.mrf.mxu2 }
 0x553   : > { %v1765_v45 = vadd.f32 %v1764_v34, %v1651_v13 }
 0x554   : > { %v1654_v50 = vpop.f32.mrf.mxu1 }
 0x555   : > { %1806 = vst [vmem:[%s3534_s11 + $0xd8] sm:$0xff] %v1765_v45 }
 0x55a   : > { %v1767_v38 = vpop.f32.mrf.mxu2 }
 0x55b   : > { %v1768_v41 = vadd.f32 %v1767_v38, %v1654_v50 }
 0x55c   : > { %v1657_v48 = vpop.f32.mrf.mxu1 }
 0x55d   : > { %1807 = vst [vmem:[%s3534_s11 + $0xe0] sm:$0xff] %v1768_v41 }
 0x562   : > { %v1770_v63 = vpop.f32.mrf.mxu2 }
 0x563   : > { %v1771_v33 = vadd.f32 %v1770_v63, %v1657_v48 }
 0x564   : > { %v1660_v16 = vpop.f32.mrf.mxu1 }
 0x565   : > { %1808 = vst [vmem:[%s3534_s11 + $0xe8] sm:$0xff] %v1771_v33 }
 0x56a   : > { %v1773_v27 = vpop.f32.mrf.mxu2 }
 0x56b   : > { %v1774_v29 = vadd.f32 %v1773_v27, %v1660_v16 }
 0x56c   : > { %v1663_v43 = vpop.f32.mrf.mxu1 }
 0x56d   : > { %1809 = vst [vmem:[%s3534_s11 + $0xf0] sm:$0xff] %v1774_v29 }
 0x572   : > { %v1776_v20 = vpop.f32.mrf.mxu2 }
 0x573   : > { %v1777_v0 = vadd.f32 %v1776_v20, %v1663_v43 }
 0x575   : > { %1810 = vst [vmem:[%s3534_s11 + $0xf8] sm:$0xff] %v1777_v0 }
 0x576   : > { %2270 = shalt.err (!%p2267_p3)
}
 0x577   : > { %s2307_s9 = smov 128   ;;  %s2308_s11 = smov 8  }
 0x578   : > { %2010 = dma.vmem_to_hbm [thread:$0]  (%p2372_p5), %s1825_s27, 4096, %s1827_s28, %s1812_s29, %s2307_s9, %s2307_s9, %s2308_s11  }
 0x579 PF: > { %p2016_p4 = scmp.ge.s32.totalorder %s2305_s18, 2  ;;  %s1841_s12 = sand.u32 1, %s2293_s15  }
 0x57a   : > { %s1842_s13 = scalar_lea.sflag [#allocation3], %s1841_s12 }
 0x57b   : > { %p2013_p7 = pnand %p2016_p4, %p2376_p6 }
 0x57d   : > { %p2014_p8 = pneg %p2013_p7 }
 0x57f   : > { %2288 = dma.done.wait (%p2014_p8), %s1842_s13, 4096  }
 0x580   : > { %2290 = vsyncadd (%p2014_p8), %s1842_s13, 4294963200  ;;  %p14_p9 = scmp.ge.s32.totalorder %s2359_s21, 4   ;;  %s3879_s15 = smov %s2297_s16 }
 0x581   : > { %s3880_s16 = smov %s2301_s17  ;;  %s3881_s17 = smov %s2370_s24 }
 0x582   : > { %s3882_s18 = smov %s2359_s21  ;;  %16 = sbr.rel (!%p14_p9) target bundleno = 3 (0x3), region = 71 }
 0x587   :  { %1848 = vsyncpa [#allocation3], 1 }
 0x588   :  { %1850 = vsyncpa [#allocation3 + $0x1], 1 }

</bundles_post_ra>
